<compile_context>
chip_gen: v6e
topology: v6e:2x2x1
jax: 0.10.0
libtpu: 0.0.40
codegen_flags: <defaults>
</compile_context>

<pallas_src>
import jax
import jax.numpy as jnp
from jax.experimental import pallas as pl
from jax.experimental.pallas import tpu as pltpu

# ---------------- synthetic hyper-parameters ("hp") ----------------
VOCAB_SIZE = 10     # hp.vocab_size
HIDDEN     = 32     # hp.hidden_size   (unit-embedding dim)
F0_HIDDEN  = 32     # hp.f0_hidden_size
V_HIDDEN   = 32     # hp.voiced_hidden_size
DP_HIDDEN  = 32     # hp.dp_hidden_size
PITCH_BINS = 16     # hp.pitch_bins
E_BINS     = 8      # hp.E_bins
SPK_DIM    = 32     # speaker-embedding dim (from Speech2Vector)
N_MELS     = 80     # Unit2Mel output channels

# ---------------- packed layouts (all 128-lane aligned) ----------------
TILE_M  = 128                 # rows per grid step (bf16 sublane tile multiple)
OUT_W   = 128                 # output lanes: [mel 0:80 | f0 80:96 | dur 96 | V 97 | 0]
W_COLS  = 512                 # packed weight blob columns
P1_OFF, P2_OFF, P3_OFF = 0, 256, 384   # pass-1 / pass-2 / pass-3 column blocks
DUR_LANE, V_LANE = 96, 97              # head lanes inside pass-2 / output block


def tester_kernel(tok_ref, pvq_ref, l_ref, spkmel_ref, w_ref, out_ref):
    f32, bf16 = jnp.float32, jnp.bfloat16

    def dot(a, b):
        return jnp.dot(a, b, preferred_element_type=f32)

    # ---- in-kernel embedding gather as one-hot @ (emb-folded W1 rows) --------
    lane32 = jax.lax.broadcasted_iota(jnp.int32, pvq_ref.shape, 1)      # [TM,32]
    onehot = jnp.where(lane32 == tok_ref[...], 1.0, 0.0).astype(bf16)   # [TM,32]

    # ---- pass 1: hidden feats (dp|f0|v) + mel_base, K split per input block --
    #   cols 0:32 dp_h, 32:64 f0_feats, 64:96 v_feats, 96:128 pad,
    #   cols 128:208 mel_base (U @ wm_u), 208:256 pad.
    h_full = (dot(onehot,       w_ref[0:32,  P1_OFF:P2_OFF]) +
              dot(pvq_ref[...], w_ref[32:64, P1_OFF:P2_OFF]) +
              dot(l_ref[...],   w_ref[64:96, P1_OFF:P2_OFF]))           # [TM,256] f32
    H        = jnp.maximum(h_full[:, 0:128], 0.0).astype(bf16)          # [TM,128]
    mel_base = h_full[:, 128:256]                                       # [TM,128]

    # ---- pass 2: all heads in one matmul -------------------------------------
    #   lanes 0:8 E logits, 8:24 f0 logits, 96 log-duration, 97 voiced logit.
    pre = dot(H, w_ref[:, P2_OFF:P3_OFF])                               # [TM,128] f32

    sig     = jax.nn.sigmoid(pre)                                       # E / f0 lanes
    v_all   = jnp.where(pre > 0.0, 1.0, 0.0)            # lane 97 == (sigmoid>0.5)
    dur_all = jnp.maximum(jnp.round(jnp.exp(pre) - 1.0), 1.0)           # lane 96

    lane128 = jax.lax.broadcasted_iota(jnp.int32, pre.shape, 1)
    # Replace the voiced-logit lane with the binary mask so the V @ wm_v mel
    # contribution rides the same MXU pass (W3 row 97 = wm_v).
    merged = jnp.where(lane128 == V_LANE, v_all, sig).astype(bf16)      # [TM,128]

    # ---- pass 3: [mel | f0 | 0...] in one matmul (identity block passes f0) --
    res = dot(merged, w_ref[:, P3_OFF:W_COLS]) + mel_base + spkmel_ref[...]

    # ---- single unmasked lane-dense store (dur / V merged via lane selects) --
    out = jnp.where(lane128 == DUR_LANE, dur_all,
                    jnp.where(lane128 == V_LANE, v_all, res))
    out_ref[...] = out.astype(out_ref.dtype)

    # TODO(synk): LengthRegulator expansion (dynamic output length), HiFi-GAN
    # vocoder and pyloudnorm loudness normalization have no clean static Pallas
    # equivalent (external checkpoints / host-side numpy).


def init_params(key):
    ks = jax.random.split(key, 16)
    s = 0.1
    emb = jax.random.normal(ks[0], (VOCAB_SIZE + 1, HIDDEN), jnp.float32) * s
    emb = emb.at[VOCAB_SIZE].set(0.0)  # padding_idx
    return {
        "embedding": emb,
        "wdp_l":  jax.random.normal(ks[1],  (HIDDEN, DP_HIDDEN), jnp.float32) * s,
        "wdp_u":  jax.random.normal(ks[2],  (HIDDEN, DP_HIDDEN), jnp.float32) * s,
        "wdp_out": jax.random.normal(ks[3], (DP_HIDDEN, 1), jnp.float32) * s,
        "wf_pvq": jax.random.normal(ks[4],  (HIDDEN, F0_HIDDEN), jnp.float32) * s,
        "wf_u":   jax.random.normal(ks[5],  (HIDDEN, F0_HIDDEN), jnp.float32) * s,
        "wf_out": jax.random.normal(ks[6],  (F0_HIDDEN, PITCH_BINS), jnp.float32) * s,
        "wv_pvq": jax.random.normal(ks[7],  (HIDDEN, V_HIDDEN), jnp.float32) * s,
        "wv_u":   jax.random.normal(ks[8],  (HIDDEN, V_HIDDEN), jnp.float32) * s,
        "wv_out": jax.random.normal(ks[9],  (V_HIDDEN, 1), jnp.float32) * s,
        "we":     jax.random.normal(ks[10], (F0_HIDDEN, E_BINS), jnp.float32) * s,
        "wm_e":   jax.random.normal(ks[11], (E_BINS, N_MELS), jnp.float32) * s,
        "wm_f0":  jax.random.normal(ks[12], (PITCH_BINS, N_MELS), jnp.float32) * s,
        "wm_v":   jax.random.normal(ks[13], (1, N_MELS), jnp.float32) * s,
        "wm_spk": jax.random.normal(ks[14], (SPK_DIM, N_MELS), jnp.float32) * s,
        "wm_u":   jax.random.normal(ks[15], (HIDDEN, N_MELS), jnp.float32) * s,
    }


def pack_params(p):
    """Pack all 15 logical weights into ONE [128, 512] bf16 blob (called once)."""
    f32 = jnp.float32
    emb = p["embedding"]                                   # [11, 32]
    W = jnp.zeros((128, W_COLS), f32)

    nv = VOCAB_SIZE + 1
    # pass-1 block (cols 0:256); rows 0:32 token one-hot (embedding folded in),
    # rows 32:64 PVQ, rows 64:96 L.
    W = W.at[0:nv,     0:32].set(emb @ p["wdp_u"])         # dp_h     <- U
    W = W.at[0:nv,    32:64].set(emb @ p["wf_u"])          # f0_feats <- U
    W = W.at[0:nv,    64:96].set(emb @ p["wv_u"])          # v_feats  <- U
    W = W.at[0:nv,   128:128 + N_MELS].set(emb @ p["wm_u"])  # mel_base <- U
    W = W.at[32:64,   32:64].set(p["wf_pvq"])              # f0_feats <- PVQ
    W = W.at[32:64,   64:96].set(p["wv_pvq"])              # v_feats  <- PVQ
    W = W.at[64:96,    0:32].set(p["wdp_l"])               # dp_h     <- L

    # pass-2 block (cols 256:384): E 0:8, f0 8:24, log-dur 96, voiced 97.
    W = W.at[32:64, P2_OFF:P2_OFF + E_BINS].set(p["we"])
    W = W.at[32:64, P2_OFF + 8:P2_OFF + 8 + PITCH_BINS].set(p["wf_out"])
    W = W.at[0:32,  P2_OFF + DUR_LANE:P2_OFF + DUR_LANE + 1].set(p["wdp_out"])
    W = W.at[64:96, P2_OFF + V_LANE:P2_OFF + V_LANE + 1].set(p["wv_out"])

    # pass-3 block (cols 384:512): mel 0:80, f0 identity passthrough 80:96,
    # row 97 carries wm_v (V merged into the matmul LHS lane 97).
    W = W.at[0:E_BINS,  P3_OFF:P3_OFF + N_MELS].set(p["wm_e"])
    W = W.at[8:8 + PITCH_BINS, P3_OFF:P3_OFF + N_MELS].set(p["wm_f0"])
    W = W.at[8:8 + PITCH_BINS, P3_OFF + 80:P3_OFF + 96].set(
        jnp.eye(PITCH_BINS, dtype=f32))
    W = W.at[V_LANE:V_LANE + 1, P3_OFF:P3_OFF + N_MELS].set(p["wm_v"])

    # speaker projection kept separate (runtime spkr input): [32, 128] padded.
    wm_spk_pad = jnp.zeros((SPK_DIM, OUT_W), f32).at[:, 0:N_MELS].set(p["wm_spk"])

    return {"w": W.astype(jnp.bfloat16), "wm_spk_pad": wm_spk_pad}


@jax.jit
def tester_forward(tokens, pvq, spkr, l_feat, packed):
    """Returns the packed [M, 128] output: [mel 0:80 | f0 80:96 | dur 96 | V 97]."""
    m = tokens.shape[0]
    m_pad = ((m + TILE_M - 1) // TILE_M) * TILE_M

    tok = tokens.reshape(m, 1).astype(jnp.int32)
    pvq16 = pvq.astype(jnp.bfloat16)
    l16 = l_feat.astype(jnp.bfloat16)
    if m_pad != m:
        tok = jnp.concatenate(
            [tok, jnp.full((m_pad - m, 1), VOCAB_SIZE, jnp.int32)], axis=0)
        pvq16 = jnp.concatenate(
            [pvq16, jnp.zeros((m_pad - m, HIDDEN), jnp.bfloat16)], axis=0)
        l16 = jnp.concatenate(
            [l16, jnp.zeros((m_pad - m, HIDDEN), jnp.bfloat16)], axis=0)

    # T-invariant speaker mel contribution (reviewer-suggested precompute).
    spk_mel = jnp.dot(spkr.astype(jnp.float32), packed["wm_spk_pad"])   # [1, 128]

    out = pl.pallas_call(
        tester_kernel,
        out_shape=jax.ShapeDtypeStruct((m_pad, OUT_W), jnp.float32),
        grid=(m_pad // TILE_M,),
        in_specs=[
            pl.BlockSpec((TILE_M, 1),      lambda i: (i, 0)),   # tokens
            pl.BlockSpec((TILE_M, HIDDEN), lambda i: (i, 0)),   # PVQ
            pl.BlockSpec((TILE_M, HIDDEN), lambda i: (i, 0)),   # L
            pl.BlockSpec((1, OUT_W),       lambda i: (0, 0)),   # spk mel (resident)
            pl.BlockSpec((128, W_COLS),    lambda i: (0, 0)),   # weight blob (resident)
        ],
        out_specs=pl.BlockSpec((TILE_M, OUT_W), lambda i: (i, 0)),
        compiler_params=pltpu.CompilerParams(
            dimension_semantics=("parallel",)),                 # v7x: 2 TCs
    )(tok, pvq16, l16, spk_mel, packed["w"])

    return out[:m]


if __name__ == "__main__":
    key = jax.random.PRNGKey(0)
    k_tok, k_pvq, k_spk, k_l, k_par = jax.random.split(key, 5)

    params = init_params(k_par)
    packed = pack_params(params)

    # 32 utterances x 8 frames -> M = 256 rows (two parallel 128-row tiles).
    B, T = 32, 8
    M = B * T
    tokens = jax.random.randint(k_tok, (M,), 0, VOCAB_SIZE, dtype=jnp.int32)
    pvq    = jax.random.normal(k_pvq, (M, HIDDEN), jnp.float32)
    spkr   = jax.random.normal(k_spk, (1, SPK_DIM), jnp.float32)
    l_feat = jax.random.normal(k_l,   (M, HIDDEN), jnp.float32)

    out = tester_forward(tokens, pvq, spkr, l_feat, packed)
    jax.block_until_ready(out)

    mel    = out[:, 0:N_MELS]
    f0     = out[:, N_MELS:N_MELS + PITCH_BINS]
    dur    = out[:, DUR_LANE:DUR_LANE + 1]
    voiced = out[:, V_LANE:V_LANE + 1]

    assert mel.shape == (M, N_MELS) and dur.shape == (M, 1)
    assert f0.shape == (M, PITCH_BINS) and voiced.shape == (M, 1)
    assert bool(jnp.all(jnp.isfinite(mel)))
    assert bool(jnp.all(dur >= 1.0))
    assert bool(jnp.all((voiced == 0.0) | (voiced == 1.0)))

    # f32 reference for the f0 path (validates embedding fold, pass-1 relu,
    # pass-2 heads, sigmoid, and the pass-3 identity passthrough).
    U_ref = jnp.take(params["embedding"], tokens, axis=0)
    h_f0 = jnp.maximum(U_ref @ params["wf_u"] + pvq @ params["wf_pvq"], 0.0)
    f0_ref = jax.nn.sigmoid(h_f0 @ params["wf_out"])
    assert float(jnp.max(jnp.abs(f0 - f0_ref))) < 3e-2   # bf16 matmul tolerance

    print("KERNEL_OK")
</pallas_src>

<mosaic_0001>
module attributes {stable_mosaic.version = 11 : i64} {
  func.func @tester_kernel(%arg0: i32, %arg1: memref<128x1xi32, #tpu.memory_space<vmem>>, %arg2: memref<128x32xbf16, #tpu.memory_space<vmem>>, %arg3: memref<128x32xbf16, #tpu.memory_space<vmem>>, %arg4: memref<1x128xf32, #tpu.memory_space<vmem>>, %arg5: memref<128x512xbf16, #tpu.memory_space<vmem>>, %arg6: memref<128x128xf32, #tpu.memory_space<vmem>>) attributes {dimension_semantics = [#tpu.dimension_semantics<parallel>], iteration_bounds = array<i64: 2>, scalar_prefetch = 0 : i64, scratch_operands = 0 : i64, tpu.core_type = #tpu.core_type<tc>, window_params = [{transform_indices = @transform_0, window_bounds = array<i64: 128, 1>}, {transform_indices = @transform_1, window_bounds = array<i64: 128, 32>}, {transform_indices = @transform_2, window_bounds = array<i64: 128, 32>}, {pipeline_mode = #tpu.pipeline_mode<synchronous>, transform_indices = @transform_3, window_bounds = array<i64: 1, 128>}, {pipeline_mode = #tpu.pipeline_mode<synchronous>, transform_indices = @transform_4, window_bounds = array<i64: 128, 512>}, {transform_indices = @transform_5, window_bounds = array<i64: 128, 128>}]} {
    %0 = tpu.iota {dimensions = array<i32: 1>} : vector<128x32xi32>
    %c0 = arith.constant 0 : index
    %c0_0 = arith.constant 0 : index
    %1 = vector.load %arg1[%c0, %c0_0] : memref<128x1xi32, #tpu.memory_space<vmem>>, vector<128x1xi32>
    %2 = vector.broadcast %1 : vector<128x1xi32> to vector<128x32xi32>
    %3 = arith.cmpi eq, %0, %2 : vector<128x32xi32>
    %cst = arith.constant 1.000000e+00 : f32
    %cst_1 = arith.constant 0.000000e+00 : f32
    %4 = vector.broadcast %cst : f32 to vector<128x32xf32>
    %5 = vector.broadcast %cst_1 : f32 to vector<128x32xf32>
    %6 = arith.select %3, %4, %5 : vector<128x32xi1>, vector<128x32xf32>
    %7 = arith.truncf %6 : vector<128x32xf32> to vector<128x32xbf16>
    %c0_2 = arith.constant 0 : index
    %c0_3 = arith.constant 0 : index
    %8 = vector.load %arg5[%c0_2, %c0_3] : memref<128x512xbf16, #tpu.memory_space<vmem>>, vector<32x256xbf16>
    %cst_4 = arith.constant dense<0.000000e+00> : vector<128x256xf32>
    %9 = tpu.matmul %7, %8, %cst_4 {dimension_numbers = #tpu.dot_dimension_numbers<[1], [0], [0], [1], [0, 0, 1, 1], [], []>} : vector<128x32xbf16>, vector<32x256xbf16>, vector<128x256xf32> -> vector<128x256xf32>
    %c0_5 = arith.constant 0 : index
    %c0_6 = arith.constant 0 : index
    %10 = vector.load %arg2[%c0_5, %c0_6] : memref<128x32xbf16, #tpu.memory_space<vmem>>, vector<128x32xbf16>
    %c32 = arith.constant 32 : index
    %c0_7 = arith.constant 0 : index
    %11 = vector.load %arg5[%c32, %c0_7] : memref<128x512xbf16, #tpu.memory_space<vmem>>, vector<32x256xbf16>
    %cst_8 = arith.constant dense<0.000000e+00> : vector<128x256xf32>
    %12 = tpu.matmul %10, %11, %cst_8 {dimension_numbers = #tpu.dot_dimension_numbers<[1], [0], [0], [1], [0, 0, 1, 1], [], []>} : vector<128x32xbf16>, vector<32x256xbf16>, vector<128x256xf32> -> vector<128x256xf32>
    %13 = arith.addf %9, %12 : vector<128x256xf32>
    %c0_9 = arith.constant 0 : index
    %c0_10 = arith.constant 0 : index
    %14 = vector.load %arg3[%c0_9, %c0_10] : memref<128x32xbf16, #tpu.memory_space<vmem>>, vector<128x32xbf16>
    %c64 = arith.constant 64 : index
    %c0_11 = arith.constant 0 : index
    %15 = vector.load %arg5[%c64, %c0_11] : memref<128x512xbf16, #tpu.memory_space<vmem>>, vector<32x256xbf16>
    %cst_12 = arith.constant dense<0.000000e+00> : vector<128x256xf32>
    %16 = tpu.matmul %14, %15, %cst_12 {dimension_numbers = #tpu.dot_dimension_numbers<[1], [0], [0], [1], [0, 0, 1, 1], [], []>} : vector<128x32xbf16>, vector<32x256xbf16>, vector<128x256xf32> -> vector<128x256xf32>
    %17 = arith.addf %13, %16 : vector<128x256xf32>
    %18 = vector.extract_strided_slice %17 {offsets = [0, 0], sizes = [128, 128], strides = [1, 1]} : vector<128x256xf32> to vector<128x128xf32>
    %cst_13 = arith.constant 0.000000e+00 : f32
    %19 = vector.broadcast %cst_13 : f32 to vector<128x128xf32>
    %20 = arith.maximumf %18, %19 : vector<128x128xf32>
    %21 = arith.truncf %20 : vector<128x128xf32> to vector<128x128xbf16>
    %22 = vector.extract_strided_slice %17 {offsets = [0, 128], sizes = [128, 128], strides = [1, 1]} : vector<128x256xf32> to vector<128x128xf32>
    %c0_14 = arith.constant 0 : index
    %c256 = arith.constant 256 : index
    %23 = vector.load %arg5[%c0_14, %c256] : memref<128x512xbf16, #tpu.memory_space<vmem>>, vector<128x128xbf16>
    %cst_15 = arith.constant dense<0.000000e+00> : vector<128x128xf32>
    %24 = tpu.matmul %21, %23, %cst_15 {dimension_numbers = #tpu.dot_dimension_numbers<[1], [0], [0], [1], [0, 0, 1, 1], [], []>} : vector<128x128xbf16>, vector<128x128xbf16>, vector<128x128xf32> -> vector<128x128xf32>
    %25 = arith.negf %24 : vector<128x128xf32>
    %26 = math.exp %25 : vector<128x128xf32>
    %cst_16 = arith.constant 1.000000e+00 : f32
    %27 = vector.broadcast %cst_16 : f32 to vector<128x128xf32>
    %28 = arith.addf %27, %26 : vector<128x128xf32>
    %29 = arith.divf %27, %28 : vector<128x128xf32>
    %cst_17 = arith.constant 0.000000e+00 : f32
    %30 = vector.broadcast %cst_17 : f32 to vector<128x128xf32>
    %31 = arith.cmpf ogt, %24, %30 : vector<128x128xf32>
    %cst_18 = arith.constant 1.000000e+00 : f32
    %cst_19 = arith.constant 0.000000e+00 : f32
    %32 = vector.broadcast %cst_18 : f32 to vector<128x128xf32>
    %33 = vector.broadcast %cst_19 : f32 to vector<128x128xf32>
    %34 = arith.select %31, %32, %33 : vector<128x128xi1>, vector<128x128xf32>
    %35 = math.exp %24 : vector<128x128xf32>
    %cst_20 = arith.constant 1.000000e+00 : f32
    %36 = vector.broadcast %cst_20 : f32 to vector<128x128xf32>
    %37 = arith.subf %35, %36 : vector<128x128xf32>
    %38 = math.roundeven %37 : vector<128x128xf32>
    %cst_21 = arith.constant 1.000000e+00 : f32
    %39 = vector.broadcast %cst_21 : f32 to vector<128x128xf32>
    %40 = arith.maximumf %38, %39 : vector<128x128xf32>
    %41 = tpu.iota {dimensions = array<i32: 1>} : vector<128x128xi32>
    %c97_i32 = arith.constant 97 : i32
    %42 = vector.broadcast %c97_i32 : i32 to vector<128x128xi32>
    %43 = arith.cmpi eq, %41, %42 : vector<128x128xi32>
    %44 = arith.select %43, %34, %29 : vector<128x128xi1>, vector<128x128xf32>
    %45 = arith.truncf %44 : vector<128x128xf32> to vector<128x128xbf16>
    %c0_22 = arith.constant 0 : index
    %c384 = arith.constant 384 : index
    %46 = vector.load %arg5[%c0_22, %c384] : memref<128x512xbf16, #tpu.memory_space<vmem>>, vector<128x128xbf16>
    %cst_23 = arith.constant dense<0.000000e+00> : vector<128x128xf32>
    %47 = tpu.matmul %45, %46, %cst_23 {dimension_numbers = #tpu.dot_dimension_numbers<[1], [0], [0], [1], [0, 0, 1, 1], [], []>} : vector<128x128xbf16>, vector<128x128xbf16>, vector<128x128xf32> -> vector<128x128xf32>
    %48 = arith.addf %47, %22 : vector<128x128xf32>
    %c0_24 = arith.constant 0 : index
    %c0_25 = arith.constant 0 : index
    %49 = vector.load %arg4[%c0_24, %c0_25] : memref<1x128xf32, #tpu.memory_space<vmem>>, vector<1x128xf32>
    %50 = vector.broadcast %49 : vector<1x128xf32> to vector<128x128xf32>
    %51 = arith.addf %48, %50 : vector<128x128xf32>
    %c96_i32 = arith.constant 96 : i32
    %52 = vector.broadcast %c96_i32 : i32 to vector<128x128xi32>
    %53 = arith.cmpi eq, %41, %52 : vector<128x128xi32>
    %c97_i32_26 = arith.constant 97 : i32
    %54 = vector.broadcast %c97_i32_26 : i32 to vector<128x128xi32>
    %55 = arith.cmpi eq, %41, %54 : vector<128x128xi32>
    %56 = arith.select %55, %34, %51 : vector<128x128xi1>, vector<128x128xf32>
    %57 = arith.select %53, %40, %56 : vector<128x128xi1>, vector<128x128xf32>
    %c0_27 = arith.constant 0 : index
    %c0_28 = arith.constant 0 : index
    %58 = vector.load %arg6[%c0_27, %c0_28] : memref<128x128xf32, #tpu.memory_space<vmem>>, vector<128x128xf32>
    tpu.vector_store %arg6[%c0_27, %c0_28], %57 {strides = array<i32>} : memref<128x128xf32, #tpu.memory_space<vmem>>, vector<128x128xf32>,
    return
  }
  func.func @transform_0(%arg0: i32) -> (i32, i32) {
    %c0_i32 = arith.constant 0 : i32
    %c0_i32_0 = arith.constant 0 : i32
    return %arg0, %c0_i32 : i32, i32
  }
  func.func @transform_1(%arg0: i32) -> (i32, i32) {
    %c0_i32 = arith.constant 0 : i32
    %c0_i32_0 = arith.constant 0 : i32
    return %arg0, %c0_i32 : i32, i32
  }
  func.func @transform_2(%arg0: i32) -> (i32, i32) {
    %c0_i32 = arith.constant 0 : i32
    %c0_i32_0 = arith.constant 0 : i32
    return %arg0, %c0_i32 : i32, i32
  }
  func.func @transform_3(%arg0: i32) -> (i32, i32) {
    %c0_i32 = arith.constant 0 : i32
    %c0_i32_0 = arith.constant 0 : i32
    %c0_i32_1 = arith.constant 0 : i32
    return %c0_i32, %c0_i32_0 : i32, i32
  }
  func.func @transform_4(%arg0: i32) -> (i32, i32) {
    %c0_i32 = arith.constant 0 : i32
    %c0_i32_0 = arith.constant 0 : i32
    %c0_i32_1 = arith.constant 0 : i32
    return %c0_i32, %c0_i32_0 : i32, i32
  }
  func.func @transform_5(%arg0: i32) -> (i32, i32) {
    %c0_i32 = arith.constant 0 : i32
    %c0_i32_0 = arith.constant 0 : i32
    return %arg0, %c0_i32 : i32, i32
  }
}

</mosaic_0001>

<bundles_post_ra>
// kernel: tester_forward.1
= control target key start
LH: loop header
LB: loop body
LE: loop exit
PB: predicated region body
PF: predicated region fallthrough
CT: control target
= control target key end

     0   :  { %10 = vsyncpa [#allocation3], 0  ;;  %s3342_s0 = inlined_call_operand.vmem [shape: s32[256,1], index: 0, kind: input, shape index: {}]   ;;  %s3343_s1 = inlined_call_operand.vmem [shape: bf16[256,32], index: 1, kind: input, shape index: {}]   ;;  %s3344_s2 = inlined_call_operand.vmem [shape: bf16[256,32], index: 2, kind: input, shape index: {}]   ;;  %s3345_s3 = inlined_call_operand.vmem [shape: f32[1,128], index: 3, kind: input, shape index: {}]   ;;  %s3346_s4 = inlined_call_operand.vmem [shape: bf16[128,512], index: 4, kind: input, shape index: {}]   ;;  %s3347_s5 = inlined_call_operand.hbm [shape: f32[256,128], index: 5, kind: output, shape index: {}]  }
   0x1   :  { %12 = vsyncpa [#allocation3 + $0x1], 0  ;;  %s2386_s18 = smov 0   ;;  %s2388_s19 = smov 0  }
   0x2   :  { %s2390_s20 = smov 0   ;;  %s2392_s21 = smov 0  }
   0x3 LB: > { %s2407_s22 = sadd.s32 4294967295, %s2349_s21   ;;  %s1756_s23 = sadd.s32 4294967294, %s2349_s21   ;;  %s2349_s21 = sphi %s2392_s21, %s3393_s21   ;;  %s2345_s20 = sphi %s2390_s20, %s3392_s20   ;;  %s2341_s19 = sphi %s2388_s19, %s3391_s19   ;;  %s2337_s18 = sphi %s2386_s18, %s3390_s18  }
   0x4   : > { %s2411_s24 = sadd.s32 1, %s2349_s21   ;;  %s145_s25 = sadd.s32 1, %s2345_s20 }
   0x5   : > { %s142_s26 = ssub.s32 %s2349_s21, %s2411_s24  ;;  %p155_p0 = scmp.ne.s32.totalorder %s2345_s20, %s2341_s19 }
   0x6   : > { %p143_p1 = scmp.eq.s32.totalorder %s142_s26, 0  ;;  %p156_p2 = scmp.eq.s32.totalorder %s2407_s22, 1 }
   0x7   : > { %p161_p3 = scmp.ne.s32.totalorder %s2341_s19, %s2337_s18  ;;  %p162_p4 = scmp.eq.s32.totalorder %s1756_s23, 1 }
   0x8   : > { %s2422_s27 = scalar_select %p143_p1, %s2345_s20, %s145_s25  }
   0x9   : > { %p2424_p5 = por %p156_p2, %p155_p0  ;;  %p2428_p6 = por %p162_p4, %p161_p3 }
   0xa   : > { %p1759_p7 = scmp.ge.s32.totalorder %s2349_s21, 1  ;;  %p213_p8 = scmp.lt.s32.totalorder %s2349_s21, 3 }
   0xc   : > { %p214_p9 = pnand %p1759_p7, %p213_p8 }
   0xe   : > { %217 = sbr.rel (%p214_p9) target bundleno = 880 (0x370), region = 40 }
  0x13   : > { %s1761_s30 = sshll.u32 %s2407_s22, 4  ;;  %v2143_v0 = vld [vmem:[%s3346_s4 + $0x64] ss:$16 sps:$4 sm:$0xff]   ;;  %v2351_v1 = vmov 0   ;;  %v2145_v2 = vld [vmem:[%s3346_s4 + $0x60] ss:$16 sps:$4 sm:$0xff]   ;;  %v271_v44 = vlaneseq }
  0x14   : > { %2142 = vset.pattern.permute.xlu1 %v2351_v1  ;;  %2141 = vset.pattern.permute.xlu0 %v2351_v1  ;;  %p252_p10 = scmp.lt.s32.totalorder %s1761_s30, 31  ;;  %v2146_v3 = vld [vmem:[%s3346_s4 + $0x44] ss:$16 sps:$4 sm:$0xff]   ;;  %v2148_v4 = vld [vmem:[%s3346_s4 + $0x40] ss:$16 sps:$4 sm:$0xff]   ;;  %vm461_vm0 = vcmask 261120  }
  0x15   : > { %498 = vmatprep.subr.bf16.mxu0 %v2143_v0  ;;  %518 = vmatprep.mubr.bf16.mxu0 %v2351_v1  ;;  %v2152_v5 = vld [vmem:[%s3346_s4 + $0xa4] ss:$16 sps:$4 sm:$0xff]   ;;  %v2165_v7 = vld [vmem:[%s3346_s4 + $0x20] ss:$16 sps:$4 sm:$0xff]   ;;  %v2177_v45 = vld [vmem:[%s3346_s4 + $0xe8] ss:$16 sps:$4 sm:$0xff]  }
  0x16   : > { %s3395_s30 = smov (!%p252_p10, %s1761_s30), 31  ;;  %499 = vmatpush1.bf16.msra.mxu0 %v2145_v2  ;;  %675 = vmatprep.mubr.bf16.mxu1 %v2351_v1  ;;  %v2163_v6 = vld [vmem:[%s3346_s4 + $0x24] ss:$16 sps:$4 sm:$0xff]   ;;  %v2150_v13 = vld [vmem:[%s3346_s4 + $0xa0] ss:$16 sps:$4 sm:$0xff]   ;;  %v2562_v46 = vand.u32 127, %v271_v44 }
  0x17   : > { %500 = vmatprep.subr.bf16.mxu0 %v2146_v3  ;;  %s1762_s14 = sshll.u32 %s3395_s30, 3  ;;  %s1764_s9 = sshll.u32 %s3395_s30, 2  ;;  %655 = vmatprep.subr.bf16.mxu1 %v2163_v6  ;;  %v2159_v16 = vld [vmem:[%s3346_s4 + $0x84] ss:$16 sps:$4 sm:$0xff]   ;;  %v2157_v17 = vld [vmem:[%s3346_s4 + $0x80] ss:$16 sps:$4 sm:$0xff]  }
  0x18   : > { %s2460_s25 = scalar_lea.vmem %s3342_s0, %s1762_s14  ;;  %s2478_s12 = scalar_lea.vmem %s3343_s1, %s1764_s9  ;;  %656 = vmatpush1.bf16.msra.mxu1 %v2165_v7  ;;  %v2166_v22 = vld [vmem:[%s3346_s4 + $0x4] ss:$16 sps:$4 sm:$0xff]   ;;  %v2169_v24 = vld [vmem:[%s3346_s4] ss:$16 sps:$4 sm:$0xff]   ;;  %v3348_v51 = vmov 0.0  }
  0x19   : > { %v275_v8 = vld [vmem:[%s2460_s25 + $0x10] sm:$0xff]  ;;  %v273_v9 = vld [vmem:[%s2460_s25] sm:$0xff]  ;;  %v276_v10 = vld [vmem:[%s2460_s25 + $0x18] sm:$0xff]  ;;  %s2502_s7 = scalar_lea.vmem %s3344_s2, %s1764_s9  ;;  %657 = vmatprep.subr.bf16.mxu1 %v2166_v22  ;;  %s1873_s15 = sshll.u32 %s2407_s22, 11 }
  0x1a   : > { %501 = vmatpush1.bf16.msra.mxu0 %v2148_v4  ;;  %296 = vperm.xlu1 %2142, %v275_v8   ;;  %v274_v11 = vld [vmem:[%s2460_s25 + $0x8] sm:$0xff]  ;;  %v277_v14 = vld [vmem:[%s2460_s25 + $0x20] sm:$0xff]  ;;  %v280_v18 = vld [vmem:[%s2460_s25 + $0x38] sm:$0xff]  ;;  %s3289_s22 = scalar_lea.hbm %s3347_s5, %s1873_s15 }
  0x1b   : > { %290 = vperm.xlu0 %2141, %v273_v9   ;;  %872 = vmatprep.subr.bf16.mxu0 %v2152_v5  ;;  %v278_v12 = vld [vmem:[%s2460_s25 + $0x28] sm:$0xff]  ;;  %v2149_v15 = vld [vmem:[%s2478_s12] sm:$0xff]   ;;  %v279_v19 = vld [vmem:[%s2460_s25 + $0x30] sm:$0xff] }
  0x1c   : > { %v2153_v20 = vld [vmem:[%s2478_s12 + $0x8] sm:$0xff]   ;;  %v281_v23 = vld [vmem:[%s2460_s25 + $0x40] sm:$0xff]  ;;  %v284_v25 = vld [vmem:[%s2460_s25 + $0x58] sm:$0xff]  ;;  %658 = vmatpush1.bf16.msra.mxu1 %v2169_v24 }
  0x1d   : > { %1779 = vmatmul.mubr.msk.bf16.vlgmr.msra.gmra.mxu0 %vm461_vm0, %v2149_v15  ;;  %v282_v21 = vld [vmem:[%s2460_s25 + $0x48] sm:$0xff]  ;;  %v283_v26 = vld [vmem:[%s2460_s25 + $0x50] sm:$0xff]  ;;  %v285_v29 = vld [vmem:[%s2460_s25 + $0x60] sm:$0xff]  ;;  %1906 = vmatprep.subr.bf16.mxu1 %v2177_v45 }
  0x1e   : > { %299 = vperm.xlu1 %2142, %v276_v10   ;;  %873 = vmatpush1.bf16.msra.mxu0 %v2150_v13  ;;  %v2154_v27 = vld [vmem:[%s2478_s12 + $0x10] sm:$0xff]   ;;  %v286_v28 = vld [vmem:[%s2460_s25 + $0x68] sm:$0xff]  ;;  %v288_v30 = vld [vmem:[%s2460_s25 + $0x78] sm:$0xff] }
  0x1f   : > { %293 = vperm.xlu0 %2141, %v274_v11   ;;  %528 = vmatprep.mubr.bf16.mxu0 %v2351_v1  ;;  %v287_v31 = vld [vmem:[%s2460_s25 + $0x70] sm:$0xff]  ;;  %v2155_v32 = vld [vmem:[%s2478_s12 + $0x18] sm:$0xff]   ;;  %v2156_v33 = vld [vmem:[%s2478_s12 + $0x20] sm:$0xff]   ;;  %s248_s25 = sand.u32 1, %s2341_s19  }
  0x20   : > { %874 = vmatprep.subr.bf16.mxu0 %v2159_v16  ;;  %v2160_v34 = vld [vmem:[%s2478_s12 + $0x28] sm:$0xff]   ;;  %v2161_v35 = vld [vmem:[%s2478_s12 + $0x30] sm:$0xff]   ;;  %v2162_v36 = vld [vmem:[%s2478_s12 + $0x38] sm:$0xff]   ;;  %s1760_s13 = sshll.u32 %s248_s25, 7  ;;  %s3302_s26 = scalar_lea.sflag [#allocation3], %s248_s25 }
  0x21   : > { %v2168_v37 = vld [vmem:[%s2502_s7] sm:$0xff]   ;;  %v2170_v38 = vld [vmem:[%s2502_s7 + $0x8] sm:$0xff]   ;;  %v2171_v39 = vld [vmem:[%s2502_s7 + $0x10] sm:$0xff]   ;;  %s3019_s14 = scalar_lea.vmem [#allocation2], %s1760_s13 }
  0x22   : > { %305 = vperm.xlu1 %2142, %v278_v12   ;;  %875 = vmatpush1.bf16.msra.mxu0 %v2157_v17  ;;  %v2172_v40 = vld [vmem:[%s2502_s7 + $0x18] sm:$0xff]   ;;  %v2173_v41 = vld [vmem:[%s2502_s7 + $0x20] sm:$0xff]   ;;  %v2174_v42 = vld [vmem:[%s2502_s7 + $0x28] sm:$0xff]   ;;  %s1670_s16 = sshll.u32 %s3019_s14, 4  ;;  %s3291_s16 = int_to_ptr.vmem [resolvable:$true] %s1670_s16 }
  0x23   : > { %302 = vperm.xlu0 %2141, %v277_v14   ;;  %v2175_v43 = vld [vmem:[%s2502_s7 + $0x30] sm:$0xff]   ;;  %v2176_v48 = vld [vmem:[%s2502_s7 + $0x38] sm:$0xff]   ;;  %s2289_s6 = scalar_lea.vmem %s3291_s16, 2048  ;;  %s2353_s7 = smov [#allocation2]  }
  0x24   : > { %v2178_v55 = vld [vmem:[%s3346_s4 + $0xc8] ss:$16 sps:$4 sm:$0xff]   ;;  %p2290_p11 = scmp.ne.s32.totalorder %s3291_s16, %s2289_s6  ;;  %s2293_s8 = sshll.u32 %s2353_s7, 4  ;;  %s2294_s8 = int_to_ptr.vmem [resolvable:$false] %s2293_s8 }
  0x25   : > { %1780 = vmatmul.mubr.msk.bf16.gmra.mxu0 %vm461_vm0, %v2153_v20  ;;  %v2179_v59 = vld [vmem:[%s3346_s4 + $0xa8] ss:$16 sps:$4 sm:$0xff]   ;;  %s2295_s10 = scalar_lea.vmem %s2294_s8, 4096  ;;  %p2296_p0 = scmp.lt.s32.totalorder %s3291_s16, %s2294_s8 }
  0x26   : > { %311 = vperm.xlu1 %2142, %v280_v18   ;;  %538 = vmatprep.mubr.bf16.mxu0 %v2351_v1  ;;  %p2291_p12 = pnand %p2290_p11, %p2424_p5  ;;  %p2297_p1 = scmp.lt.s32.totalorder %s2295_s10, %s2289_s6 }
  0x27   : > { %308 = vperm.xlu0 %2141, %v279_v19  }
  0x28   : > { %p2292_p13 = pneg %p2291_p12  ;;  %p2298_p2 = por %p2297_p1, %p2296_p0 }
  0x2a   : > { %317 = vperm.xlu1 %2142, %v282_v21   ;;  %p2299_p3 = pnand %p2298_p2, %p2292_p13 }
  0x2b   : > { %314 = vperm.xlu0 %2141, %v281_v23  }
  0x2d   : > { %1781 = vmatmul.mubr.msk.bf16.gmra.mxu0 %vm461_vm0, %v2154_v27 }
  0x2e   : > { %323 = vperm.xlu1 %2142, %v284_v25   ;;  %548 = vmatprep.mubr.bf16.mxu0 %v2351_v1 }
  0x2f   : > { %320 = vperm.xlu0 %2141, %v283_v26  }
  0x32   : > { %329 = vperm.xlu1 %2142, %v286_v28   ;;  %v2180_v28 = vld [vmem:[%s3346_s4 + $0x88] ss:$16 sps:$4 sm:$0xff]  }
  0x33   : > { %326 = vperm.xlu0 %2141, %v285_v29  }
  0x35   : > { %1782 = vmatmul.mubr.msk.bf16.gmra.mxu0 %vm461_vm0, %v2155_v32  ;;  %v2182_v32 = vld [vmem:[%s3346_s4 + $0x48] ss:$16 sps:$4 sm:$0xff]  }
  0x36   : > { %335 = vperm.xlu1 %2142, %v288_v30   ;;  %558 = vmatprep.mubr.bf16.mxu0 %v2351_v1  ;;  %v2181_v30 = vld [vmem:[%s3346_s4 + $0x68] ss:$16 sps:$4 sm:$0xff]  }
  0x37   : > { %332 = vperm.xlu0 %2141, %v287_v31  }
  0x3d   : > { %1783 = vmatmul.mubr.msk.bf16.gmra.mxu0 %vm461_vm0, %v2156_v33 }
  0x3e   : > { %568 = vmatprep.mubr.bf16.mxu0 %v2351_v1 }
  0x45   : > { %1784 = vmatmul.mubr.msk.bf16.gmra.mxu0 %vm461_vm0, %v2160_v34 }
  0x46   : > { %578 = vmatprep.mubr.bf16.mxu0 %v2351_v1 }
  0x4d   : > { %1785 = vmatmul.mubr.msk.bf16.gmra.mxu0 %vm461_vm0, %v2161_v35  ;;  %v2183_v35 = vld [vmem:[%s3346_s4 + $0x28] ss:$16 sps:$4 sm:$0xff]  }
  0x4e   : > { %588 = vmatprep.mubr.bf16.mxu0 %v2351_v1 }
  0x55   : > { %1786 = vmatmul.mubr.msk.bf16.gmra.mxu0 %vm461_vm0, %v2162_v36 }
  0x56   : > { %892 = vmatprep.mubr.bf16.mxu0 %v2351_v1 }
  0x5d   : > { %1811 = vmatmul.mubr.msk.bf16.vlgmr.msra.gmra.mxu0 %vm461_vm0, %v2168_v37 }
  0x5e   : > { %902 = vmatprep.mubr.bf16.mxu0 %v2351_v1 }
  0x65   : > { %1812 = vmatmul.mubr.msk.bf16.gmra.mxu0 %vm461_vm0, %v2170_v38  ;;  %v2184_v38 = vld [vmem:[%s3346_s4 + $0x8] ss:$16 sps:$4 sm:$0xff]  }
  0x66   : > { %912 = vmatprep.mubr.bf16.mxu0 %v2351_v1 }
  0x6d   : > { %1813 = vmatmul.mubr.msk.bf16.gmra.mxu0 %vm461_vm0, %v2171_v39 }
  0x6e   : > { %922 = vmatprep.mubr.bf16.mxu0 %v2351_v1 }
  0x75   : > { %1814 = vmatmul.mubr.msk.bf16.gmra.mxu0 %vm461_vm0, %v2172_v40 }
  0x76   : > { %932 = vmatprep.mubr.bf16.mxu0 %v2351_v1 }
  0x7d   : > { %1815 = vmatmul.mubr.msk.bf16.gmra.mxu0 %vm461_vm0, %v2173_v41 }
  0x7e   : > { %942 = vmatprep.mubr.bf16.mxu0 %v2351_v1 }
  0x85   : > { %1816 = vmatmul.mubr.msk.bf16.gmra.mxu0 %vm461_vm0, %v2174_v42 }
  0x86   : > { %952 = vmatprep.mubr.bf16.mxu0 %v2351_v1 }
  0x8d   : > { %1817 = vmatmul.mubr.msk.bf16.gmra.mxu0 %vm461_vm0, %v2175_v43 }
  0x8e   : > { %962 = vmatprep.mubr.bf16.mxu0 %v2351_v1 }
  0x95   : > { %v297_v49 = vpop.permute.xlu1 %296  ;;  %1818 = vmatmul.mubr.msk.bf16.gmra.mxu0 %vm461_vm0, %v2176_v48 }
  0x96   : > { %v291_v47 = vpop.permute.xlu0 %290  ;;  %vm339_vm3 = vcmp.eq.s32.totalorder %v2562_v46, %v297_v49 }
  0x97   : > { %vm337_vm1 = vcmp.eq.s32.totalorder %v2562_v46, %v291_v47  ;;  %v355_v57 = vsel %vm339_vm3, 1.0, %v3348_v51 }
  0x98   : > { %v353_v52 = vsel %vm337_vm1, 1.0, %v3348_v51 }
  0x99   : > { %v300_v56 = vpop.permute.xlu1 %299 }
  0x9a   : > { %v294_v50 = vpop.permute.xlu0 %293  ;;  %vm340_vm4 = vcmp.eq.s32.totalorder %v2562_v46, %v300_v56 }
  0x9b   : > { %vm338_vm2 = vcmp.eq.s32.totalorder %v2562_v46, %v294_v50  ;;  %v356_v58 = vsel %vm340_vm4, 1.0, %v3348_v51 }
  0x9c   : > { %v354_v53 = vsel %vm338_vm2, 1.0, %v3348_v51  ;;  %v370_v62 = vpack.c.bf16 %v356_v58, %v355_v57 }
  0x9d   : > { %v369_v54 = vpack.c.bf16 %v354_v53, %v353_v52  ;;  %v306_v60 = vpop.permute.xlu1 %305 }
  0x9e   : > { %v303_v61 = vpop.permute.xlu0 %302  ;;  %vm342_vm5 = vcmp.eq.s32.totalorder %v2562_v46, %v306_v60 }
  0x9f   : > { %1791 = vmatmul.mubr.msk.bf16.vlgmr.msra.gmra.mxu1 %vm461_vm0, %v369_v54  ;;  %vm341_vm6 = vcmp.eq.s32.totalorder %v2562_v46, %v303_v61  ;;  %v358_v63 = vsel %vm342_vm5, 1.0, %v3348_v51  ;;  %vm1398_vm5 = vcmp.eq.s32.totalorder %v2562_v46, 97 }
  0xa0   : > { %685 = vmatprep.mubr.bf16.mxu1 %v2351_v1  ;;  %1907 = vmatpush3.bf16.msra.mxu1 %v2177_v45  ;;  %v357_v0 = vsel %vm341_vm6, 1.0, %v3348_v51 }
  0xa1   : > { %1908 = vmatprep.subr.bf16.mxu1 %v2178_v55  ;;  %v312_v2 = vpop.permute.xlu1 %311  ;;  %v371_v4 = vpack.c.bf16 %v358_v63, %v357_v0 }
  0xa2   : > { %v309_v3 = vpop.permute.xlu0 %308  ;;  %vm344_vm7 = vcmp.eq.s32.totalorder %v2562_v46, %v312_v2 }
  0xa3   : > { %vm343_vm8 = vcmp.eq.s32.totalorder %v2562_v46, %v309_v3  ;;  %v360_v5 = vsel %vm344_vm7, 1.0, %v3348_v51 }
  0xa4   : > { %1909 = vmatpush3.bf16.msra.mxu1 %v2178_v55  ;;  %v359_v6 = vsel %vm343_vm8, 1.0, %v3348_v51 }
  0xa5   : > { %1910 = vmatprep.subr.bf16.mxu1 %v2179_v59  ;;  %v318_v7 = vpop.permute.xlu1 %317  ;;  %v372_v9 = vpack.c.bf16 %v360_v5, %v359_v6 }
  0xa6   : > { %v315_v8 = vpop.permute.xlu0 %314  ;;  %vm346_vm9 = vcmp.eq.s32.totalorder %v2562_v46, %v318_v7 }
  0xa7   : > { %1792 = vmatmul.mubr.msk.bf16.gmra.mxu1 %vm461_vm0, %v370_v62  ;;  %vm345_vm10 = vcmp.eq.s32.totalorder %v2562_v46, %v315_v8  ;;  %v362_v10 = vsel %vm346_vm9, 1.0, %v3348_v51 }
  0xa8   : > { %695 = vmatprep.mubr.bf16.mxu1 %v2351_v1  ;;  %1911 = vmatpush3.bf16.msra.mxu1 %v2179_v59  ;;  %v361_v11 = vsel %vm345_vm10, 1.0, %v3348_v51 }
  0xa9   : > { %v324_v12 = vpop.permute.xlu1 %323  ;;  %v373_v14 = vpack.c.bf16 %v362_v10, %v361_v11  ;;  %1912 = vmatprep.subr.bf16.mxu1 %v2180_v28 }
  0xaa   : > { %v321_v13 = vpop.permute.xlu0 %320  ;;  %vm348_vm11 = vcmp.eq.s32.totalorder %v2562_v46, %v324_v12 }
  0xab   : > { %vm347_vm12 = vcmp.eq.s32.totalorder %v2562_v46, %v321_v13  ;;  %v364_v15 = vsel %vm348_vm11, 1.0, %v3348_v51 }
  0xac   : > { %v363_v16 = vsel %vm347_vm12, 1.0, %v3348_v51  ;;  %1913 = vmatpush3.bf16.msra.mxu1 %v2180_v28 }
  0xad   : > { %v330_v17 = vpop.permute.xlu1 %329  ;;  %v374_v19 = vpack.c.bf16 %v364_v15, %v363_v16  ;;  %1914 = vmatprep.subr.bf16.mxu1 %v2181_v30 }
  0xae   : > { %v327_v18 = vpop.permute.xlu0 %326  ;;  %vm350_vm13 = vcmp.eq.s32.totalorder %v2562_v46, %v330_v17 }
  0xaf   : > { %1793 = vmatmul.mubr.msk.bf16.gmra.mxu1 %vm461_vm0, %v371_v4  ;;  %vm349_vm14 = vcmp.eq.s32.totalorder %v2562_v46, %v327_v18  ;;  %v366_v20 = vsel %vm350_vm13, 1.0, %v3348_v51 }
  0xb0   : > { %705 = vmatprep.mubr.bf16.mxu1 %v2351_v1  ;;  %v365_v21 = vsel %vm349_vm14, 1.0, %v3348_v51  ;;  %1915 = vmatpush3.bf16.msra.mxu1 %v2181_v30 }
  0xb1   : > { %v336_v22 = vpop.permute.xlu1 %335  ;;  %v375_v24 = vpack.c.bf16 %v366_v20, %v365_v21  ;;  %1916 = vmatprep.subr.bf16.mxu1 %v2182_v32 }
  0xb2   : > { %v333_v23 = vpop.permute.xlu0 %332  ;;  %vm352_vm15 = vcmp.eq.s32.totalorder %v2562_v46, %v336_v22 }
  0xb3   : > { %vm351_vm1 = vcmp.eq.s32.totalorder %v2562_v46, %v333_v23  ;;  %v368_v25 = vsel %vm352_vm15, 1.0, %v3348_v51 }
  0xb4   : > { %v367_v26 = vsel %vm351_vm1, 1.0, %v3348_v51  ;;  %1917 = vmatpush3.bf16.msra.mxu1 %v2182_v32 }
  0xb5   : > { %v376_v27 = vpack.c.bf16 %v368_v25, %v367_v26  ;;  %1918 = vmatprep.subr.bf16.mxu1 %v2183_v35 }
  0xb7   : > { %1794 = vmatmul.mubr.msk.bf16.gmra.mxu1 %vm461_vm0, %v372_v9 }
  0xb8   : > { %715 = vmatprep.mubr.bf16.mxu1 %v2351_v1  ;;  %1919 = vmatpush3.bf16.msra.mxu1 %v2183_v35 }
  0xb9   : > { %1920 = vmatprep.subr.bf16.mxu1 %v2184_v38 }
  0xbc   : > { %1921 = vmatpush3.bf16.msra.mxu1 %v2184_v38 }
  0xbf   : > { %1795 = vmatmul.mubr.msk.bf16.gmra.mxu1 %vm461_vm0, %v373_v14 }
  0xc0   : > { %725 = vmatprep.mubr.bf16.mxu1 %v2351_v1 }
  0xc7   : > { %1796 = vmatmul.mubr.msk.bf16.gmra.mxu1 %vm461_vm0, %v374_v19 }
  0xc8   : > { %735 = vmatprep.mubr.bf16.mxu1 %v2351_v1 }
  0xcf   : > { %1797 = vmatmul.mubr.msk.bf16.gmra.mxu1 %vm461_vm0, %v375_v24 }
  0xd0   : > { %745 = vmatprep.mubr.bf16.mxu1 %v2351_v1 }
  0xd7   : > { %1798 = vmatmul.mubr.msk.bf16.gmra.mxu1 %vm461_vm0, %v376_v27 }
  0xdd   : > { %v520_v29 = vpop.f32.mrf.mxu0 }
  0xdf   : > { %v522_v31 = vpop.f32.mrf.mxu0 }
  0xe1   : > { %v524_v1 = vpop.f32.mrf.mxu0 }
  0xe3   : > { %v2628_v33 = vpop.f32.mrf.mxu0 }
  0xe5   : > { %v2630_v34 = vpop.f32.mrf.mxu0 }
  0xe7   : > { %v2635_v36 = vpop.f32.mrf.mxu0 }
  0xe9   : > { %v2637_v37 = vpop.f32.mrf.mxu0 }
  0xeb   : > { %v2642_v39 = vpop.f32.mrf.mxu0 }
  0xed   : > { %v2644_v40 = vpop.f32.mrf.mxu0 }
  0xef   : > { %v2646_v41 = vpop.f32.mrf.mxu0 }
  0xf1   : > { %v2648_v42 = vpop.f32.mrf.mxu0 }
  0xf3   : > { %v2650_v43 = vpop.f32.mrf.mxu0 }
  0xf5   : > { %v2652_v44 = vpop.f32.mrf.mxu0 }
  0xf7   : > { %v2654_v45 = vpop.f32.mrf.mxu0 }
  0xf9   : > { %v2656_v47 = vpop.f32.mrf.mxu0 }
  0xfb   : > { %v2658_v48 = vpop.f32.mrf.mxu0 }
  0xfd   : > { %v2660_v49 = vpop.f32.mrf.mxu0 }
  0xff   : > { %v2662_v50 = vpop.f32.mrf.mxu0 }
 0x101   : > { %v2664_v52 = vpop.f32.mrf.mxu0 }
 0x103   : > { %v2666_v53 = vpop.f32.mrf.mxu0 }
 0x105   : > { %v2668_v54 = vpop.f32.mrf.mxu0 }
 0x107   : > { %v2670_v55 = vpop.f32.mrf.mxu0 }
 0x109   : > { %v2672_v56 = vpop.f32.mrf.mxu0 }
 0x10b   : > { %v2674_v57 = vpop.f32.mrf.mxu0 }
 0x10d   : > { %v2676_v58 = vpop.f32.mrf.mxu0 }
 0x10f   : > { %v2678_v59 = vpop.f32.mrf.mxu0 }
 0x111   : > { %v2680_v60 = vpop.f32.mrf.mxu0 }
 0x113   : > { %v2682_v61 = vpop.f32.mrf.mxu0 }
 0x115   : > { %v2684_v62 = vpop.f32.mrf.mxu0 }
 0x117   : > { %v2686_v63 = vpop.f32.mrf.mxu0 }
 0x119   : > { %v2688_v0 = vpop.f32.mrf.mxu0 }
 0x11b   : > { %v2690_v2 = vpop.f32.mrf.mxu0 }
 0x11c   : > { %3353 = vst [vmem:[#allocation5_spill] sm:$0xff] %v2690_v2 }
 0x11d   : > { %v894_v3 = vpop.f32.mrf.mxu0 }
 0x11f   : > { %v896_v4 = vpop.f32.mrf.mxu0 }
 0x121   : > { %v898_v5 = vpop.f32.mrf.mxu0 }
 0x123   : > { %v900_v6 = vpop.f32.mrf.mxu0 }
 0x125   : > { %v904_v7 = vpop.f32.mrf.mxu0 }
 0x127   : > { %v906_v8 = vpop.f32.mrf.mxu0 }
 0x129   : > { %v908_v9 = vpop.f32.mrf.mxu0 }
 0x12b   : > { %v910_v10 = vpop.f32.mrf.mxu0 }
 0x12d   : > { %v914_v11 = vpop.f32.mrf.mxu0 }
 0x12f   : > { %v916_v12 = vpop.f32.mrf.mxu0 }
 0x131   : > { %v918_v13 = vpop.f32.mrf.mxu0 }
 0x133   : > { %v920_v14 = vpop.f32.mrf.mxu0 }
 0x135   : > { %v924_v15 = vpop.f32.mrf.mxu0 }
 0x137   : > { %v2692_v16 = vpop.f32.mrf.mxu0 }
 0x139   : > { %v2694_v17 = vpop.f32.mrf.mxu0 }
 0x13b   : > { %v2696_v21 = vpop.f32.mrf.mxu0 }
 0x13d   : > { %v2700_v28 = vpop.f32.mrf.mxu0 }
 0x15f   : > { %v677_v18 = vpop.f32.mrf.mxu1 }
 0x160   : > { %v678_v19 = vadd.f32 %v677_v18, %v520_v29 }
 0x161   : > { %v679_v20 = vpop.f32.mrf.mxu1 }
 0x162   : > { %v680_v22 = vadd.f32 %v679_v20, %v522_v31  ;;  %v973_v24 = vadd.f32 %v894_v3, %v678_v19  ;;  %v936_v31 = vpop.f32.mrf.mxu0 }
 0x163   : > { %v681_v23 = vpop.f32.mrf.mxu1 }
 0x164   : > { %v682_v25 = vadd.f32 %v681_v23, %v524_v1  ;;  %v2698_v26 = vadd.f32 %v896_v4, %v680_v22  ;;  %v1005_v38 = vmax.f32 %v973_v24, 0.0  ;;  %v938_v22 = vpop.f32.mrf.mxu0 }
 0x165   : > { %v683_v27 = vpop.f32.mrf.mxu1 }
 0x166   : > { %v975_v30 = vadd.f32 %v898_v5, %v682_v25  ;;  %v684_v32 = vadd.f32 %v683_v27, %v2628_v33 }
 0x167   : > { %v687_v35 = vpop.f32.mrf.mxu1 }
 0x168   : > { %v1006_v51 = vmax.f32 %v975_v30, 0.0  ;;  %v688_v29 = vadd.f32 %v687_v35, %v2630_v34  ;;  %v2704_v18 = vadd.f32 %v900_v6, %v684_v32 }
 0x169   : > { %v689_v2 = vpop.f32.mrf.mxu1 }
 0x16a   : > { %v690_v3 = vadd.f32 %v689_v2, %v2635_v36  ;;  %v1021_v1 = vpack.c.bf16 %v1006_v51, %v1005_v38  ;;  %v977_v19 = vadd.f32 %v904_v7, %v688_v29  ;;  %v940_v36 = vpop.f32.mrf.mxu0 }
 0x16b   : > { %v691_v4 = vpop.f32.mrf.mxu1 }
 0x16c   : > { %v692_v20 = vadd.f32 %v691_v4, %v2637_v37  ;;  %1922 = vmatprep.mubr.bf16.mxu1 %v1021_v1  ;;  %v2708_v5 = vadd.f32 %v906_v8, %v690_v3  ;;  %v1007_v6 = vmax.f32 %v977_v19, 0.0  ;;  %v944_v35 = vpop.f32.mrf.mxu0 }
 0x16d   : > { %v693_v33 = vpop.f32.mrf.mxu1 }
 0x16e   : > { %v979_v23 = vadd.f32 %v908_v9, %v692_v20  ;;  %v694_v24 = vadd.f32 %v693_v33, %v2642_v39  ;;  %v946_v19 = vpop.f32.mrf.mxu0 }
 0x16f   : > { %v697_v34 = vpop.f32.mrf.mxu1 }
 0x170   : > { %v1008_v25 = vmax.f32 %v979_v23, 0.0  ;;  %v698_v27 = vadd.f32 %v697_v34, %v2644_v40  ;;  %v2712_v30 = vadd.f32 %v910_v10, %v694_v24  ;;  %v948_v23 = vpop.f32.mrf.mxu0 }
 0x171   : > { %v699_v51 = vpop.f32.mrf.mxu1 }
 0x172   : > { %v1022_v2 = vpack.c.bf16 %v1008_v25, %v1007_v6  ;;  %v700_v37 = vadd.f32 %v699_v51, %v2646_v41  ;;  %v981_v8 = vadd.f32 %v914_v11, %v698_v27 }
 0x173   : > { %v701_v7 = vpop.f32.mrf.mxu1 }
 0x174   : > { %v702_v32 = vadd.f32 %v701_v7, %v2648_v42  ;;  %1923 = vmatmul.mubr.bf16.vlgmr.msra.gmra.mxu1 %v1022_v2  ;;  %v2716_v9 = vadd.f32 %v916_v12, %v700_v37  ;;  %v1009_v10 = vmax.f32 %v981_v8, 0.0 }
 0x175   : > { %v703_v39 = vpop.f32.mrf.mxu1 }
 0x176   : > { %v983_v38 = vadd.f32 %v918_v13, %v702_v32  ;;  %v704_v29 = vadd.f32 %v703_v39, %v2650_v43 }
 0x177   : > { %v707_v40 = vpop.f32.mrf.mxu1 }
 0x178   : > { %v1010_v3 = vmax.f32 %v983_v38, 0.0  ;;  %v708_v1 = vadd.f32 %v707_v40, %v2652_v44  ;;  %v2720_v4 = vadd.f32 %v920_v14, %v704_v29 }
 0x179   : > { %v709_v41 = vpop.f32.mrf.mxu1 }
 0x17a   : > { %v710_v11 = vadd.f32 %v709_v41, %v2654_v45  ;;  %v1023_v42 = vpack.c.bf16 %v1010_v3, %v1009_v10  ;;  %v985_v12 = vadd.f32 %v924_v15, %v708_v1 }
 0x17b   : > { %v711_v20 = vpop.f32.mrf.mxu1 }
 0x17c   : > { %v712_v33 = vadd.f32 %v711_v20, %v2656_v47  ;;  %1926 = vmatprep.mubr.bf16.mxu1 %v1023_v42  ;;  %v2725_v13 = vadd.f32 %v2692_v16, %v710_v11  ;;  %v1011_v34 = vmax.f32 %v985_v12, 0.0  ;;  %v950_v47 = vpop.f32.mrf.mxu0 }
 0x17d   : > { %v713_v43 = vpop.f32.mrf.mxu1 }
 0x17e   : > { %v987_v24 = vadd.f32 %v2694_v17, %v712_v33  ;;  %v714_v44 = vadd.f32 %v713_v43, %v2658_v48  ;;  %v954_v7 = vpop.f32.mrf.mxu0 }
 0x17f   : > { %v717_v14 = vpop.f32.mrf.mxu1 }
 0x180   : > { %v1012_v6 = vmax.f32 %v987_v24, 0.0  ;;  %v718_v45 = vadd.f32 %v717_v14, %v2660_v49  ;;  %v2731_v25 = vadd.f32 %v2696_v21, %v714_v44  ;;  %v956_v40 = vpop.f32.mrf.mxu0 }
 0x181   : > { %v719_v15 = vpop.f32.mrf.mxu1 }
 0x182   : > { %v720_v27 = vadd.f32 %v719_v15, %v2662_v50  ;;  %v1024_v16 = vpack.c.bf16 %v1012_v6, %v1011_v34  ;;  %v989_v2 = vadd.f32 %v2700_v28, %v718_v45  ;;  %v958_v1 = vpop.f32.mrf.mxu0 }
 0x183   : > { %v721_v51 = vpop.f32.mrf.mxu1 }
 0x184   : > { %v722_v17 = vadd.f32 %v721_v51, %v2664_v52  ;;  %1927 = vmatmul.mubr.bf16.gmra.mxu1 %v1024_v16  ;;  %v2736_v48 = vadd.f32 %v936_v31, %v720_v27  ;;  %v1013_v32 = vmax.f32 %v989_v2, 0.0  ;;  %v960_v33 = vpop.f32.mrf.mxu0 }
 0x185   : > { %v723_v37 = vpop.f32.mrf.mxu1 }
 0x186   : > { %v991_v8 = vadd.f32 %v938_v22, %v722_v17  ;;  %v724_v49 = vadd.f32 %v723_v37, %v2666_v53 }
 0x187   : > { %v727_v21 = vpop.f32.mrf.mxu1 }
 0x188   : > { %v1014_v39 = vmax.f32 %v991_v8, 0.0  ;;  %v728_v38 = vadd.f32 %v727_v21, %v2668_v54  ;;  %v2740_v50 = vadd.f32 %v940_v36, %v724_v49 }
 0x189   : > { %v729_v29 = vpop.f32.mrf.mxu1 }
 0x18a   : > { %v730_v28 = vadd.f32 %v729_v29, %v2670_v55  ;;  %v1025_v52 = vpack.c.bf16 %v1014_v39, %v1013_v32  ;;  %v993_v31 = vadd.f32 %v944_v35, %v728_v38  ;;  %v2188_v32 = vld [vmem:[%s3346_s4 + $0x8c] ss:$16 sps:$4 sm:$0xff]  }
 0x18b   : > { %v731_v10 = vpop.f32.mrf.mxu1  ;;  %v2189_v39 = vld [vmem:[%s3346_s4 + $0x6c] ss:$16 sps:$4 sm:$0xff]  }
 0x18c   : > { %v732_v3 = vadd.f32 %v731_v10, %v2672_v56  ;;  %1930 = vmatprep.mubr.bf16.mxu1 %v1025_v52  ;;  %v2744_v22 = vadd.f32 %v946_v19, %v730_v28  ;;  %v1015_v36 = vmax.f32 %v993_v31, 0.0  ;;  %v2190_v38 = vld [vmem:[%s3346_s4 + $0x4c] ss:$16 sps:$4 sm:$0xff]  }
 0x18d   : > { %v733_v53 = vpop.f32.mrf.mxu1  ;;  %v2191_v29 = vld [vmem:[%s3346_s4 + $0x2c] ss:$16 sps:$4 sm:$0xff]  }
 0x18e   : > { %v995_v41 = vadd.f32 %v948_v23, %v732_v3  ;;  %v734_v11 = vadd.f32 %v733_v53, %v2674_v57  ;;  %v964_v57 = vpop.f32.mrf.mxu0 }
 0x18f   : > { %v737_v54 = vpop.f32.mrf.mxu1 }
 0x190   : > { %v1016_v42 = vmax.f32 %v995_v41, 0.0  ;;  %v738_v20 = vadd.f32 %v737_v54, %v2676_v58  ;;  %v2748_v12 = vadd.f32 %v950_v47, %v734_v11 }
 0x191   : > { %v739_v55 = vpop.f32.mrf.mxu1 }
 0x192   : > { %v740_v35 = vadd.f32 %v739_v55, %v2678_v59  ;;  %v1026_v56 = vpack.c.bf16 %v1016_v42, %v1015_v36  ;;  %v997_v19 = vadd.f32 %v954_v7, %v738_v20  ;;  %v966_v59 = vpop.f32.mrf.mxu0 }
 0x193   : > { %v741_v43 = vpop.f32.mrf.mxu1 }
 0x194   : > { %v742_v24 = vadd.f32 %v741_v43, %v2680_v60  ;;  %1931 = vmatmul.mubr.bf16.gmra.mxu1 %v1026_v56  ;;  %v2752_v23 = vadd.f32 %v956_v40, %v740_v35  ;;  %v1017_v6 = vmax.f32 %v997_v19, 0.0  ;;  %v2192_v40 = vld [vmem:[%s3346_s4 + $0xc] ss:$16 sps:$4 sm:$0xff]  }
 0x195   : > { %v743_v44 = vpop.f32.mrf.mxu1 }
 0x196   : > { %v999_v14 = vadd.f32 %v958_v1, %v742_v24  ;;  %v744_v34 = vadd.f32 %v743_v44, %v2682_v61  ;;  %v968_v61 = vpop.f32.mrf.mxu0 }
 0x197   : > { %v747_v58 = vpop.f32.mrf.mxu1 }
 0x198   : > { %v1018_v45 = vmax.f32 %v999_v14, 0.0  ;;  %v748_v15 = vadd.f32 %v747_v58, %v2684_v62  ;;  %v2756_v47 = vadd.f32 %v960_v33, %v744_v34  ;;  %v2185_v62 = vld [vmem:[%s3346_s4 + $0xec] ss:$16 sps:$4 sm:$0xff]  }
 0x199   : > { %v749_v27 = vpop.f32.mrf.mxu1  ;;  %1938 = vmatprep.subr.bf16.mxu1 %v2185_v62 }
 0x19a   : > { %v750_v16 = vadd.f32 %v749_v27, %v2686_v63  ;;  %v1027_v60 = vpack.c.bf16 %v1018_v45, %v1017_v6  ;;  %v1001_v2 = vadd.f32 %v964_v57, %v748_v15  ;;  %1939 = vmatpush3.bf16.msra.mxu1 %v2185_v62  ;;  %v2186_v63 = vld [vmem:[%s3346_s4 + $0xcc] ss:$16 sps:$4 sm:$0xff]  }
 0x19b   : > { %v751_v51 = vpop.f32.mrf.mxu1  ;;  %1940 = vmatprep.subr.bf16.mxu1 %v2186_v63 }
 0x19c   : > { %v752_v17 = vadd.f32 %v751_v51, %v2688_v0  ;;  %1934 = vmatprep.mubr.bf16.mxu1 %v1027_v60  ;;  %v2760_v37 = vadd.f32 %v966_v59, %v750_v16  ;;  %v1019_v8 = vmax.f32 %v1001_v2, 0.0  ;;  %v2187_v0 = vld [vmem:[%s3346_s4 + $0xac] ss:$16 sps:$4 sm:$0xff]  }
 0x19d   : > { %v2786_v28 = vpop.f32.mrf.mxu1 }
 0x19e   : > { %v1003_v7 = vadd.f32 %v968_v61, %v752_v17  ;;  %1941 = vmatpush3.bf16.msra.mxu1 %v2186_v63  ;;  %v3354_v61 = vmov 0.0  }
 0x19f   : > { %1942 = vmatprep.subr.bf16.mxu1 %v2187_v0 }
 0x1a0   : > { %v1020_v49 = vmax.f32 %v1003_v7, 0.0 }
 0x1a2   : > { %v1028_v21 = vpack.c.bf16 %v1020_v49, %v1019_v8  ;;  %1943 = vmatpush3.bf16.msra.mxu1 %v2187_v0 }
 0x1a3   : > { %1944 = vmatprep.subr.bf16.mxu1 %v2188_v32 }
 0x1a4   : > { %1935 = vmatmul.mubr.bf16.gmra.mxu1 %v1028_v21 }
 0x1a6   : > { %1945 = vmatpush3.bf16.msra.mxu1 %v2188_v32 }
 0x1a7   : > { %1946 = vmatprep.subr.bf16.mxu1 %v2189_v39 }
 0x1aa   : > { %1947 = vmatpush3.bf16.msra.mxu1 %v2189_v39 }
 0x1ab   : > { %1948 = vmatprep.subr.bf16.mxu1 %v2190_v38 }
 0x1ae   : > { %1949 = vmatpush3.bf16.msra.mxu1 %v2190_v38 }
 0x1af   : > { %1950 = vmatprep.subr.bf16.mxu1 %v2191_v29 }
 0x1b2   : > { %1951 = vmatpush3.bf16.msra.mxu1 %v2191_v29 }
 0x1b3   : > { %1952 = vmatprep.subr.bf16.mxu1 %v2192_v40 }
 0x1b6   : > { %1953 = vmatpush3.bf16.msra.mxu1 %v2192_v40 }
 0x234   : > { %v2788_v52 = vpop.f32.mrf.mxu1 }
 0x235   : > { %v1829_v10 = vmul.f32 -1.442695, %v2788_v52  ;;  %vm1288_vm4 = vcmp.gt.f32.partialorder %v2788_v52, 0.0 }
 0x236   : > { %v2791_v31 = vpop.f32.mrf.mxu1  ;;  %v2842_v0 = vsel %vm1288_vm4, 1.0, %v3354_v61  ;;  %vm1607_vm4 = vcmp.eq.s32.totalorder %v2562_v46, 96 }
 0x237   : > { %2193 = vpow2.f32 %v1829_v10  ;;  %v1827_v3 = vmul.f32 -1.442695, %v2791_v31  ;;  %vm1286_vm2 = vcmp.gt.f32.partialorder %v2791_v31, 0.0 }
 0x238   : > { %v2794_v53 = vpop.f32.mrf.mxu1  ;;  %v2832_v49 = vsel %vm1286_vm2, 1.0, %v3354_v61 }
 0x239   : > { %2195 = vpow2.f32 %v1827_v3  ;;  %v1830_v1 = vmul.f32 -1.442695, %v2794_v53  ;;  %vm1289_vm0 = vcmp.gt.f32.partialorder %v2794_v53, 0.0 }
 0x23a   : > { %v2797_v41 = vpop.f32.mrf.mxu1  ;;  %v2827_v7 = vsel %vm1289_vm0, 1.0, %v3354_v61 }
 0x23b   : > { %2197 = vpow2.f32 %v1830_v1  ;;  %v1828_v11 = vmul.f32 -1.442695, %v2797_v41  ;;  %vm1287_vm3 = vcmp.gt.f32.partialorder %v2797_v41, 0.0 }
 0x23c   : > { %v2838_v62 = vsel %vm1287_vm3, 1.0, %v3354_v61 }
 0x23d   : > { %2199 = vpow2.f32 %v1828_v11 }
 0x244   : > { %v2194_v54 = vpop.eup %2193  ;;  %v2800_v36 = vpop.f32.mrf.mxu1 }
 0x245   : > { %v1240_v20 = vadd.f32 1.0, %v2194_v54  ;;  %v1833_v34 = vmul.f32 -1.442695, %v2800_v36  ;;  %vm1292_vm6 = vcmp.gt.f32.partialorder %v2800_v36, 0.0 }
 0x246   : > { %v2196_v42 = vpop.eup %2195  ;;  %v2802_v35 = vpop.f32.mrf.mxu1 }
 0x247   : > { %v1238_v33 = vadd.f32 1.0, %v2196_v42  ;;  %2201 = vrcp.f32 %v1240_v20  ;;  %v1831_v57 = vmul.f32 -1.442695, %v2802_v35  ;;  %vm1290_vm7 = vcmp.gt.f32.partialorder %v2802_v35, 0.0 }
 0x248   : > { %v2198_v55 = vpop.eup %2197  ;;  %v2804_v24 = vpop.f32.mrf.mxu1 }
 0x249   : > { %v1241_v56 = vadd.f32 1.0, %v2198_v55  ;;  %v1834_v14 = vmul.f32 -1.442695, %v2804_v24  ;;  %vm1293_vm8 = vcmp.gt.f32.partialorder %v2804_v24, 0.0 }
 0x24a   : > { %v2200_v43 = vpop.eup %2199  ;;  %v2807_v44 = vpop.f32.mrf.mxu1 }
 0x24b   : > { %2203 = vrcp.f32 %v1241_v56  ;;  %v1239_v19 = vadd.f32 1.0, %v2200_v43  ;;  %v1832_v58 = vmul.f32 -1.442695, %v2807_v44  ;;  %vm1291_vm9 = vcmp.gt.f32.partialorder %v2807_v44, 0.0 }
 0x24c   : > { %2205 = vrcp.f32 %v1238_v33 }
 0x24d   : > { %2207 = vrcp.f32 %v1239_v19 }
 0x24e   : > { %2209 = vpow2.f32 %v1831_v57 }
 0x24f   : > { %2211 = vpow2.f32 %v1834_v14 }
 0x250   : > { %2213 = vpow2.f32 %v1832_v58 }
 0x251   : > { %2215 = vpow2.f32 %v1833_v34 }
 0x254   : > { %v2812_v6 = vpop.f32.mrf.mxu1  ;;  %v2202_v15 = vpop.eup %2201 }
 0x255   : > { %v1837_v16 = vmul.f32 -1.442695, %v2812_v6  ;;  %v1401_v38 = vsel %vm1398_vm5, %v2842_v0, %v2202_v15  ;;  %vm1296_vm13 = vcmp.gt.f32.partialorder %v2812_v6, 0.0 }
 0x256   : > { %v2814_v45 = vpop.f32.mrf.mxu1 }
 0x257   : > { %v1835_v59 = vmul.f32 -1.442695, %v2814_v45  ;;  %vm1294_vm10 = vcmp.gt.f32.partialorder %v2814_v45, 0.0 }
 0x258   : > { %v2204_v27 = vpop.eup %2203  ;;  %v2821_v60 = vpop.f32.mrf.mxu1 }
 0x259   : > { %v2206_v51 = vpop.eup %2205  ;;  %v1838_v2 = vmul.f32 -1.442695, %v2821_v60  ;;  %2217 = vpow2.f32 %v1835_v59  ;;  %v1402_v21 = vsel %vm1398_vm5, %v2827_v7, %v2204_v27  ;;  %vm1297_vm12 = vcmp.gt.f32.partialorder %v2821_v60, 0.0 }
 0x25a   : > { %v2208_v17 = vpop.eup %2207  ;;  %v2829_v8 = vpop.f32.mrf.mxu1  ;;  %2219 = vpow2.f32 %v1837_v16  ;;  %v1399_v32 = vsel %vm1398_vm5, %v2832_v49, %v2206_v51  ;;  %v1416_v40 = vpack.c.bf16 %v1402_v21, %v1401_v38  ;;  %v2869_v38 = vsel %vm1292_vm6, 1.0, %v3354_v61 }
 0x25b   : > { %v1836_v63 = vmul.f32 -1.442695, %v2829_v8  ;;  %v1400_v39 = vsel %vm1398_vm5, %v2838_v62, %v2208_v17  ;;  %2221 = vpow2.f32 %v1838_v2  ;;  %v2210_v10 = vpop.eup %2209  ;;  %vm1295_vm11 = vcmp.gt.f32.partialorder %v2829_v8, 0.0 }
 0x25c   : > { %v1415_v29 = vpack.c.bf16 %v1400_v39, %v1399_v32  ;;  %v2212_v3 = vpop.eup %2211  ;;  %v1242_v54 = vadd.f32 1.0, %v2210_v10  ;;  %v2876_v10 = vsel %vm1293_vm8, 1.0, %v3354_v61 }
 0x25d   : > { %2223 = vpow2.f32 %v1836_v63  ;;  %v2214_v1 = vpop.eup %2213  ;;  %v1245_v42 = vadd.f32 1.0, %v2212_v3  ;;  %v2879_v3 = vsel %vm1291_vm9, 1.0, %v3354_v61 }
 0x25e   : > { %1954 = vmatprep.mubr.bf16.mxu1 %v1415_v29  ;;  %v2216_v11 = vpop.eup %2215  ;;  %v1243_v20 = vadd.f32 1.0, %v2214_v1  ;;  %2225 = vrcp.f32 %v1242_v54 }
 0x25f   : > { %1955 = vmatmul.mubr.bf16.vlgmr.msra.gmra.mxu1 %v1416_v40  ;;  %v1244_v55 = vadd.f32 1.0, %v2216_v11  ;;  %2227 = vrcp.f32 %v1245_v42  ;;  %v2873_v40 = vsel %vm1290_vm7, 1.0, %v3354_v61 }
 0x260   : > { %2229 = vrcp.f32 %v1243_v20 }
 0x261   : > { %2231 = vrcp.f32 %v1244_v55 }
 0x264   : > { %v2853_v56 = vpop.f32.mrf.mxu1 }
 0x265   : > { %v1841_v16 = vmul.f32 -1.442695, %v2853_v56  ;;  %vm1300_vm0 = vcmp.gt.f32.partialorder %v2853_v56, 0.0 }
 0x266   : > { %v2218_v33 = vpop.eup %2217  ;;  %v2855_v34 = vpop.f32.mrf.mxu1 }
 0x267   : > { %v2220_v43 = vpop.eup %2219  ;;  %v1246_v57 = vadd.f32 1.0, %v2218_v33  ;;  %v1839_v2 = vmul.f32 -1.442695, %v2855_v34  ;;  %vm1298_vm15 = vcmp.gt.f32.partialorder %v2855_v34, 0.0 }
 0x268   : > { %v2222_v19 = vpop.eup %2221  ;;  %v1248_v15 = vadd.f32 1.0, %v2220_v43  ;;  %v2857_v27 = vpop.f32.mrf.mxu1 }
 0x269   : > { %v1249_v58 = vadd.f32 1.0, %v2222_v19  ;;  %2233 = vrcp.f32 %v1246_v57  ;;  %v1842_v32 = vmul.f32 -1.442695, %v2857_v27  ;;  %v2897_v57 = vsel %vm1294_vm10, 1.0, %v3354_v61 }
 0x26a   : > { %v2224_v14 = vpop.eup %2223  ;;  %v2862_v17 = vpop.f32.mrf.mxu1  ;;  %vm1301_vm14 = vcmp.gt.f32.partialorder %v2857_v27, 0.0 }
 0x26b   : > { %v1247_v59 = vadd.f32 1.0, %v2224_v14  ;;  %2235 = vrcp.f32 %v1249_v58  ;;  %v2226_v51 = vpop.eup %2225  ;;  %v1840_v29 = vmul.f32 -1.442695, %v2862_v17  ;;  %v2900_v14 = vsel %vm1295_vm11, 1.0, %v3354_v61 }
 0x26c   : > { %v2228_v21 = vpop.eup %2227  ;;  %v1403_v1 = vsel %vm1398_vm5, %v2873_v40, %v2226_v51  ;;  %vm1299_vm1 = vcmp.gt.f32.partialorder %v2862_v17, 0.0 }
 0x26d   : > { %2237 = vrcp.f32 %v1247_v59  ;;  %v2230_v63 = vpop.eup %2229  ;;  %v1406_v54 = vsel %vm1398_vm5, %v2876_v10, %v2228_v21  ;;  %v2916_v21 = vsel %vm1296_vm13, 1.0, %v3354_v61 }
 0x26e   : > { %2239 = vrcp.f32 %v1248_v15  ;;  %v2232_v39 = vpop.eup %2231  ;;  %v1404_v11 = vsel %vm1398_vm5, %v2879_v3, %v2230_v63 }
 0x26f   : > { %2241 = vpow2.f32 %v1841_v16  ;;  %v1417_v42 = vpack.c.bf16 %v1404_v11, %v1403_v1  ;;  %v1405_v20 = vsel %vm1398_vm5, %v2869_v38, %v2232_v39  ;;  %v2910_v16 = vsel %vm1297_vm12, 1.0, %v3354_v61 }
 0x270   : > { %2243 = vpow2.f32 %v1839_v2  ;;  %v1418_v33 = vpack.c.bf16 %v1406_v54, %v1405_v20 }
 0x271   : > { %2245 = vpow2.f32 %v1842_v32  ;;  %1958 = vmatprep.mubr.bf16.mxu1 %v1417_v42 }
 0x272   : > { %2247 = vpow2.f32 %v1840_v29  ;;  %1959 = vmatmul.mubr.bf16.gmra.mxu1 %v1418_v33 }
 0x276   : > { %v2234_v55 = vpop.eup %2233 }
 0x277   : > { %v1407_v58 = vsel %vm1398_vm5, %v2897_v57, %v2234_v55 }
 0x278   : > { %v2236_v43 = vpop.eup %2235 }
 0x279   : > { %v1410_v2 = vsel %vm1398_vm5, %v2910_v16, %v2236_v43 }
 0x27a   : > { %v2238_v19 = vpop.eup %2237 }
 0x27b   : > { %v1408_v15 = vsel %vm1398_vm5, %v2900_v14, %v2238_v19  ;;  %v2240_v59 = vpop.eup %2239 }
 0x27c   : > { %v1419_v51 = vpack.c.bf16 %v1408_v15, %v1407_v58  ;;  %v2242_v63 = vpop.eup %2241  ;;  %v1409_v32 = vsel %vm1398_vm5, %v2916_v21, %v2240_v59  ;;  %v2926_v58 = vsel %vm1301_vm14, 1.0, %v3354_v61  ;;  %v2929_v59 = vsel %vm1298_vm15, 1.0, %v3354_v61 }
 0x27d   : > { %v2244_v39 = vpop.eup %2243  ;;  %v1420_v29 = vpack.c.bf16 %v1410_v2, %v1409_v32  ;;  %v1252_v54 = vadd.f32 1.0, %v2242_v63  ;;  %v2938_v63 = vsel %vm1300_vm0, 1.0, %v3354_v61 }
 0x27e   : > { %1962 = vmatprep.mubr.bf16.mxu1 %v1419_v51  ;;  %v1250_v1 = vadd.f32 1.0, %v2244_v39  ;;  %v2246_v11 = vpop.eup %2245  ;;  %v2932_v51 = vsel %vm1299_vm1, 1.0, %v3354_v61  ;;  %v1318_v61 = vmul.f32 1.442695, %v2791_v31 }
 0x27f   : > { %1963 = vmatmul.mubr.bf16.gmra.mxu1 %v1420_v29  ;;  %v1253_v42 = vadd.f32 1.0, %v2246_v11  ;;  %v2248_v20 = vpop.eup %2247  ;;  %3355 = vst [vmem:[#allocation6_spill] sm:$0xff] %v2932_v51 }
 0x280   : > { %2249 = vrcp.f32 %v1250_v1  ;;  %v1251_v55 = vadd.f32 1.0, %v2248_v20  ;;  %v1320_v20 = vmul.f32 1.442695, %v2797_v41 }
 0x281   : > { %2251 = vrcp.f32 %v1253_v42  ;;  %v1324_v42 = vmul.f32 1.442695, %v2794_v53  ;;  %v1330_v53 = vmul.f32 1.442695, %v2800_v36 }
 0x282   : > { %2253 = vrcp.f32 %v1252_v54  ;;  %v1322_v54 = vmul.f32 1.442695, %v2788_v52 }
 0x283   : > { %2255 = vrcp.f32 %v1251_v55 }
 0x284   : > { %2257 = vpow2.f32 %v1322_v54 }
 0x285   : > { %2259 = vpow2.f32 %v1318_v61  ;;  %v1332_v61 = vmul.f32 1.442695, %v2804_v24  ;;  %v1338_v24 = vmul.f32 1.442695, %v2812_v6  ;;  %v1340_v6 = vmul.f32 1.442695, %v2821_v60 }
 0x286   : > { %2261 = vpow2.f32 %v1324_v42  ;;  %v1328_v42 = vmul.f32 1.442695, %v2807_v44  ;;  %v1336_v60 = vmul.f32 1.442695, %v2829_v8 }
 0x287   : > { %2263 = vpow2.f32 %v1320_v20 }
 0x288   : > { %2265 = vpow2.f32 %v1330_v53  ;;  %v1334_v53 = vmul.f32 1.442695, %v2814_v45  ;;  %v2986_v45 = vld [vmem:[%s3345_s3] ss:$0 sm:$0xff] }
 0x28d   : > { %v2250_v33 = vpop.eup %2249 }
 0x28e   : > { %v2252_v43 = vpop.eup %2251  ;;  %v1411_v32 = vsel %vm1398_vm5, %v2929_v59, %v2250_v33 }
 0x28f   : > { %v2254_v19 = vpop.eup %2253  ;;  %v1414_v2 = vsel %vm1398_vm5, %v2926_v58, %v2252_v43 }
 0x290   : > { %v2256_v15 = vpop.eup %2255  ;;  %v1413_v1 = vsel %vm1398_vm5, %v2938_v63, %v2254_v19 }
 0x291   : > { %v1412_v39 = vsel %vm1398_vm5, %v2932_v51, %v2256_v15  ;;  %v1422_v11 = vpack.c.bf16 %v1414_v2, %v1413_v1  ;;  %v2258_v55 = vpop.eup %2257 }
 0x292   : > { %v1421_v29 = vpack.c.bf16 %v1412_v39, %v1411_v32  ;;  %v2260_v33 = vpop.eup %2259  ;;  %v1845_v43 = vadd.f32 -1.0, %v2258_v55 }
 0x293   : > { %v2262_v15 = vpop.eup %2261  ;;  %v2953_v2 = vadd.f32 -1.0, %v2260_v33 }
 0x294   : > { %1966 = vmatprep.mubr.bf16.mxu1 %v1421_v29  ;;  %v2264_v19 = vpop.eup %2263  ;;  %v1988_v32 = vcvt.f32.s32 %v1845_v43  ;;  %v2955_v39 = vadd.f32 -1.0, %v2262_v15  ;;  %v1986_v15 = vand.u32 2147483647, %v1845_v43  ;;  %v1991_v36 = vand.u32 2147483648, %v1845_v43 }
 0x295   : > { %1967 = vmatmul.mubr.bf16.gmra.mxu1 %v1422_v11  ;;  %v2957_v52 = vadd.f32 -1.0, %v2264_v19  ;;  %v1972_v31 = vcvt.f32.s32 %v2953_v2  ;;  %v1326_v11 = vmul.f32 1.442695, %v2802_v35  ;;  %v1975_v35 = vand.u32 2147483648, %v2953_v2 }
 0x296   : > { %v1989_v41 = vcvt.s32.f32 %v1988_v32  ;;  %v1996_v29 = vcvt.f32.s32 %v2955_v39  ;;  %v1970_v32 = vand.u32 2147483647, %v2953_v2  ;;  %vm2971_vm2 = vcmp.lt.f32.partialorder %v1986_v15, 8388608.0 }
 0x297   : > { %v1980_v1 = vcvt.f32.s32 %v2957_v52  ;;  %v1973_v54 = vcvt.s32.f32 %v1972_v31  ;;  %2267 = vpow2.f32 %v1326_v11  ;;  %v1999_v11 = vand.u32 2147483648, %v2955_v39 }
 0x298   : > { %v1990_v20 = vand.u32 2147483647, %v1989_v41  ;;  %v1997_v55 = vcvt.s32.f32 %v1996_v29  ;;  %2269 = vpow2.f32 %v1332_v61  ;;  %vm2977_vm3 = vcmp.lt.f32.partialorder %v1970_v32, 8388608.0 }
 0x299   : > { %v1981_v33 = vcvt.s32.f32 %v1980_v1  ;;  %v1974_v19 = vand.u32 2147483647, %v1973_v54  ;;  %2271 = vpow2.f32 %v1328_v42  ;;  %v1994_v1 = vand.u32 2147483647, %v2955_v39 }
 0x29a   : > { %v1992_v51 = vor.u32 %v1991_v36, %v1990_v20  ;;  %v1998_v31 = vand.u32 2147483647, %v1997_v55  ;;  %v1983_v61 = vand.u32 2147483648, %v2957_v52  ;;  %2273 = vpow2.f32 %v1338_v24  ;;  %v2266_v24 = vpop.eup %2265 }
 0x29b   : > { %v1982_v44 = vand.u32 2147483647, %v1981_v33  ;;  %v1976_v29 = vor.u32 %v1975_v35, %v1974_v19  ;;  %v1978_v15 = vand.u32 2147483647, %v2957_v52  ;;  %2275 = vpow2.f32 %v1334_v53 }
 0x29c   : > { %v2000_v20 = vor.u32 %v1999_v11, %v1998_v31  ;;  %v1993_v55 = vsel %vm2971_vm2, %v1992_v51, %v1845_v43  ;;  %vm3001_vm6 = vcmp.lt.f32.partialorder %v1994_v1, 8388608.0  ;;  %2277 = vpow2.f32 %v1340_v6 }
 0x29d   : > { %v1984_v36 = vor.u32 %v1983_v61, %v1982_v44  ;;  %v1977_v35 = vsel %vm2977_vm3, %v1976_v29, %v2953_v2  ;;  %vm3013_vm7 = vcmp.lt.f32.partialorder %v1978_v15, 8388608.0  ;;  %2279 = vpow2.f32 %v1336_v60 }
 0x29e   : > { %v2001_v2 = vsel %vm3001_vm6, %v2000_v20, %v2955_v39  ;;  %v1382_v29 = vmax.f32 %v1977_v35, 1.0  ;;  %v3030_v6 = vadd.f32 -1.0, %v2266_v24 }
 0x29f   : > { %v1985_v39 = vsel %vm3013_vm7, %v1984_v36, %v2957_v52  ;;  %v1385_v20 = vmax.f32 %v2001_v2, 1.0 }
 0x2a0   : > { %v2020_v60 = vcvt.f32.s32 %v3030_v6 }
 0x2a4   : > { %v2268_v11 = vpop.eup %2267 }
 0x2a5   : > { %v2270_v61 = vpop.eup %2269  ;;  %v3041_v15 = vadd.f32 -1.0, %v2268_v11 }
 0x2a7   : > { %v2004_v51 = vcvt.f32.s32 %v3041_v15 }
 0x2a9   : > { %v2005_v53 = vcvt.s32.f32 %v2004_v51 }
 0x31f   : > { %v1956_v42 = vpop.f32.mrf.mxu1 }
 0x320   : > { %v1530_v33 = vadd.f32 %v1956_v42, %v2708_v5  ;;  %v1384_v5 = vmax.f32 %v1993_v55, 1.0  ;;  %v2272_v55 = vpop.eup %2271 }
 0x321   : > { %v1521_v19 = vpop.f32.mrf.mxu1  ;;  %v2274_v35 = vpop.eup %2273 }
 0x322   : > { %v1593_v32 = vadd.f32 %v2986_v45, %v1530_v33  ;;  %v1522_v31 = vadd.f32 %v1521_v19, %v2698_v26  ;;  %v3048_v19 = vadd.f32 -1.0, %v2270_v61 }
 0x323   : > { %v1957_v43 = vpop.f32.mrf.mxu1 }
 0x324   : > { %v1610_v8 = vsel %vm1398_vm5, %v2842_v0, %v1593_v32  ;;  %v1591_v44 = vadd.f32 %v2986_v45, %v1522_v31  ;;  %v1533_v26 = vadd.f32 %v1957_v43, %v2712_v30  ;;  %v3050_v32 = vadd.f32 -1.0, %v2272_v55  ;;  %v2276_v31 = vpop.eup %2275 }
 0x325   : > { %v1626_v41 = vsel %vm1607_vm4, %v1384_v5, %v1610_v8  ;;  %v1524_v1 = vpop.f32.mrf.mxu1  ;;  %v2021_v5 = vcvt.s32.f32 %v2020_v60  ;;  %v2028_v43 = vcvt.f32.s32 %v3048_v19  ;;  %v3058_v8 = vadd.f32 -1.0, %v2274_v35 }
 0x326   : > { %1642 = vst [vmem:[%s3019_s14 + $0x10] sm:$0xff] %v1626_v41  ;;  %v1608_v30 = vsel %vm1398_vm5, %v2832_v49, %v1591_v44  ;;  %v1594_v0 = vadd.f32 %v2986_v45, %v1533_v26  ;;  %v1525_v54 = vadd.f32 %v1524_v1, %v2704_v18  ;;  %v1383_v18 = vmax.f32 %v1985_v39, 1.0 }
 0x327   : > { %v1624_v42 = vsel %vm1607_vm4, %v1382_v29, %v1608_v30  ;;  %v2012_v24 = vcvt.f32.s32 %v3050_v32  ;;  %v2018_v44 = vand.u32 2147483647, %v3030_v6  ;;  %v2002_v26 = vand.u32 2147483647, %v3041_v15 }
 0x328   : > { %1640 = vst [vmem:[%s3019_s14] sm:$0xff] %v1624_v42  ;;  %v1611_v49 = vsel %vm1398_vm5, %v2827_v7, %v1594_v0  ;;  %v1592_v33 = vadd.f32 %v2986_v45, %v1525_v54  ;;  %v3062_v41 = vadd.f32 -1.0, %v2276_v31  ;;  %v2022_v29 = vand.u32 2147483647, %v2021_v5 }
 0x329   : > { %v1627_v52 = vsel %vm1607_vm4, %v1385_v20, %v1611_v49  ;;  %v2029_v1 = vcvt.s32.f32 %v2028_v43  ;;  %v2013_v11 = vcvt.s32.f32 %v2012_v24  ;;  %v2023_v30 = vand.u32 2147483648, %v3030_v6 }
 0x32a   : > { %1643 = vst [vmem:[%s3019_s14 + $0x18] sm:$0xff] %v1627_v52  ;;  %v1609_v36 = vsel %vm1398_vm5, %v2838_v62, %v1592_v33  ;;  %v2278_v62 = vpop.eup %2277  ;;  %v2052_v0 = vcvt.f32.s32 %v3058_v8  ;;  %v1346_v54 = vmul.f32 1.442695, %v2853_v56  ;;  %vm3069_vm8 = vcmp.lt.f32.partialorder %v2018_v44, 8388608.0 }
 0x32b   : > { %v1625_v7 = vsel %vm1607_vm4, %v1383_v18, %v1609_v36  ;;  %v2280_v2 = vpop.eup %2279  ;;  %v3066_v39 = vadd.f32 -1.0, %v2278_v62  ;;  %v2007_v42 = vand.u32 2147483648, %v3041_v15  ;;  %v2026_v20 = vand.u32 2147483647, %v3048_v19 }
 0x32c   : > { %1641 = vst [vmem:[%s3019_s14 + $0x8] sm:$0xff] %v1625_v7  ;;  %v2031_v55 = vand.u32 2147483648, %v3048_v19  ;;  %vm3076_vm9 = vcmp.lt.f32.partialorder %v2002_v26, 8388608.0  ;;  %v2006_v33 = vand.u32 2147483647, %v2005_v53  ;;  %v2036_v52 = vcvt.f32.s32 %v3062_v41 }
 0x32d   : > { %v3081_v18 = vadd.f32 -1.0, %v2280_v2  ;;  %v1342_v56 = vmul.f32 1.442695, %v2855_v34  ;;  %v2024_v36 = vor.u32 %v2023_v30, %v2022_v29  ;;  %v2030_v60 = vand.u32 2147483647, %v2029_v1 }
 0x32e   : > { %v2010_v7 = vand.u32 2147483647, %v3050_v32  ;;  %v2014_v35 = vand.u32 2147483647, %v2013_v11  ;;  %v2053_v31 = vcvt.s32.f32 %v2052_v0  ;;  %v2060_v51 = vcvt.f32.s32 %v3066_v39 }
 0x32f   : > { %2281 = vpow2.f32 %v1346_v54  ;;  %v1348_v5 = vmul.f32 1.442695, %v2857_v27  ;;  %vm3087_vm10 = vcmp.lt.f32.partialorder %v2026_v20, 8388608.0  ;;  %v2015_v24 = vand.u32 2147483648, %v3050_v32 }
 0x330   : > { %v2050_v62 = vand.u32 2147483647, %v3058_v8  ;;  %v2034_v34 = vand.u32 2147483647, %v3062_v41  ;;  %v2037_v44 = vcvt.s32.f32 %v2036_v52  ;;  %v2044_v2 = vcvt.f32.s32 %v3081_v18 }
 0x331   : > { %2283 = vpow2.f32 %v1342_v56  ;;  %v1344_v26 = vmul.f32 1.442695, %v2862_v17  ;;  %v2008_v53 = vor.u32 %v2007_v42, %v2006_v33  ;;  %v2032_v29 = vor.u32 %v2031_v55, %v2030_v60 }
 0x332   : > { %vm3096_vm11 = vcmp.lt.f32.partialorder %v2010_v7, 8388608.0  ;;  %v2055_v1 = vand.u32 2147483648, %v3058_v8  ;;  %v2016_v11 = vor.u32 %v2015_v24, %v2014_v35  ;;  %v2054_v30 = vand.u32 2147483647, %v2053_v31  ;;  %v1960_v54 = vpop.f32.mrf.mxu1 }
 0x333   : > { %v2061_v0 = vcvt.s32.f32 %v2060_v51  ;;  %2285 = vpow2.f32 %v1348_v5  ;;  %vm3101_vm12 = vcmp.lt.f32.partialorder %v2050_v62, 8388608.0  ;;  %v2039_v52 = vand.u32 2147483648, %v3062_v41 }
 0x334   : > { %v2025_v17 = vsel %vm3069_vm8, %v2024_v36, %v3030_v6  ;;  %v1546_v42 = vadd.f32 %v1960_v54, %v2725_v13  ;;  %vm3110_vm13 = vcmp.lt.f32.partialorder %v2034_v34, 8388608.0  ;;  %v2038_v33 = vand.u32 2147483647, %v2037_v44  ;;  %v1537_v60 = vpop.f32.mrf.mxu1 }
 0x335   : > { %v2045_v56 = vcvt.s32.f32 %v2044_v2  ;;  %2287 = vpow2.f32 %v1344_v26  ;;  %v2058_v7 = vand.u32 2147483647, %v3066_v39  ;;  %v2009_v31 = vsel %vm3076_vm9, %v2008_v53, %v3041_v15 }
 0x336   : > { %v1597_v35 = vadd.f32 %v2986_v45, %v1546_v42  ;;  %v1538_v6 = vadd.f32 %v1537_v60, %v2716_v9  ;;  %v2056_v13 = vor.u32 %v2055_v1, %v2054_v30  ;;  %v2062_v61 = vand.u32 2147483647, %v2061_v0  ;;  %v1961_v5 = vpop.f32.mrf.mxu1 }
 0x337   : > { %v2063_v36 = vand.u32 2147483648, %v3066_v39  ;;  %v1388_v51 = vmax.f32 %v2025_v17, 1.0  ;;  %v2033_v49 = vsel %vm3087_vm10, %v2032_v29, %v3048_v19  ;;  %v1549_v15 = vadd.f32 %v1961_v5, %v2731_v25 }
 0x338   : > { %v1614_v24 = vsel %vm1398_vm5, %v2869_v38, %v1597_v35  ;;  %v1595_v62 = vadd.f32 %v2986_v45, %v1538_v6  ;;  %v2040_v34 = vor.u32 %v2039_v52, %v2038_v33  ;;  %v2046_v9 = vand.u32 2147483647, %v2045_v56  ;;  %v1540_v26 = vpop.f32.mrf.mxu1 }
 0x339   : > { %v1630_v44 = vsel %vm1607_vm4, %v1388_v51, %v1614_v24  ;;  %v1386_v2 = vmax.f32 %v2009_v31, 1.0  ;;  %v1598_v53 = vadd.f32 %v2986_v45, %v1549_v15  ;;  %v2017_v19 = vsel %vm3096_vm11, %v2016_v11, %v3050_v32 }
 0x33a   : > { %1646 = vst [vmem:[%s3019_s14 + $0x30] sm:$0xff] %v1630_v44  ;;  %v1612_v38 = vsel %vm1398_vm5, %v2873_v40, %v1595_v62  ;;  %v1541_v25 = vadd.f32 %v1540_v26, %v2720_v4  ;;  %v2064_v43 = vor.u32 %v2063_v36, %v2062_v61  ;;  %v2047_v29 = vand.u32 2147483648, %v3081_v18 }
 0x33b   : > { %v1628_v1 = vsel %vm1607_vm4, %v1386_v2, %v1612_v38  ;;  %v1389_v30 = vmax.f32 %v2033_v49, 1.0  ;;  %v1615_v40 = vsel %vm1398_vm5, %v2876_v10, %v1598_v53  ;;  %v2057_v4 = vsel %vm3101_vm12, %v2056_v13, %v3058_v8 }
 0x33c   : > { %v2282_v54 = vpop.eup %2281  ;;  %1644 = vst [vmem:[%s3019_s14 + $0x20] sm:$0xff] %v1628_v1  ;;  %v1596_v27 = vadd.f32 %v2986_v45, %v1541_v25  ;;  %v2042_v11 = vand.u32 2147483647, %v3081_v18  ;;  %v2048_v52 = vor.u32 %v2047_v29, %v2046_v9  ;;  %v1387_v42 = vmax.f32 %v2017_v19, 1.0 }
 0x33d   : > { %v1631_v17 = vsel %vm1607_vm4, %v1389_v30, %v1615_v40  ;;  %vm3164_vm14 = vcmp.lt.f32.partialorder %v2058_v7, 8388608.0  ;;  %v3168_v35 = vadd.f32 -1.0, %v2282_v54  ;;  %v1392_v6 = vmax.f32 %v2057_v4, 1.0 }
 0x33e   : > { %v2284_v56 = vpop.eup %2283  ;;  %1647 = vst [vmem:[%s3019_s14 + $0x38] sm:$0xff] %v1631_v17  ;;  %v1613_v10 = vsel %vm1398_vm5, %v2879_v3, %v1596_v27  ;;  %v2065_v55 = vsel %vm3164_vm14, %v2064_v43, %v3066_v39  ;;  %vm3181_vm15 = vcmp.lt.f32.partialorder %v2042_v11, 8388608.0  ;;  %v3380_v11 = vld [vmem:[#allocation5_spill] sm:$0xff] }
 0x33f   : > { %v1964_v0 = vpop.f32.mrf.mxu1  ;;  %v1629_v31 = vsel %vm1607_vm4, %v1387_v42, %v1613_v10  ;;  %v3185_v36 = vadd.f32 -1.0, %v2284_v56  ;;  %v2049_v62 = vsel %vm3181_vm15, %v2048_v52, %v3081_v18  ;;  %v2084_v15 = vcvt.f32.s32 %v3168_v35 }
 0x340   : > { %v1562_v32 = vadd.f32 %v1964_v0, %v2744_v22  ;;  %v2041_v22 = vsel %vm3110_vm13, %v2040_v34, %v3062_v41  ;;  %v2286_v13 = vpop.eup %2285  ;;  %1645 = vst [vmem:[%s3019_s14 + $0x28] sm:$0xff] %v1629_v31  ;;  %v1393_v44 = vmax.f32 %v2065_v55, 1.0  ;;  %v1391_v38 = vmax.f32 %v2049_v62, 1.0 }
 0x341   : > { %v1553_v33 = vpop.f32.mrf.mxu1  ;;  %v1390_v5 = vmax.f32 %v2041_v22, 1.0  ;;  %v3199_v34 = vadd.f32 -1.0, %v2286_v13  ;;  %v2068_v18 = vcvt.f32.s32 %v3185_v36  ;;  %v2085_v19 = vcvt.s32.f32 %v2084_v15 }
 0x342   : > { %v1601_v20 = vadd.f32 %v2986_v45, %v1562_v32  ;;  %v1554_v8 = vadd.f32 %v1553_v33, %v2736_v48  ;;  %v2288_v24 = vpop.eup %2287  ;;  %v2087_v0 = vand.u32 2147483648, %v3168_v35  ;;  %v2082_v27 = vand.u32 2147483647, %v3168_v35 }
 0x343   : > { %v1965_v3 = vpop.f32.mrf.mxu1  ;;  %v3209_v26 = vadd.f32 -1.0, %v2288_v24  ;;  %v2092_v25 = vcvt.f32.s32 %v3199_v34  ;;  %v2069_v43 = vcvt.s32.f32 %v2068_v18  ;;  %v2086_v1 = vand.u32 2147483647, %v2085_v19 }
 0x344   : > { %v1618_v41 = vsel %vm1398_vm5, %v2916_v21, %v1601_v20  ;;  %v1599_v48 = vadd.f32 %v2986_v45, %v1554_v8  ;;  %v1565_v7 = vadd.f32 %v1965_v3, %v2748_v12  ;;  %v754_v52 = vadd.f32 %v2786_v28, %v3380_v11  ;;  %v970_v8 = vpop.f32.mrf.mxu0 }
 0x345   : > { %v1634_v51 = vsel %vm1607_vm4, %v1392_v6, %v1618_v41  ;;  %v1556_v21 = vpop.f32.mrf.mxu1  ;;  %v2076_v29 = vcvt.f32.s32 %v3209_v26  ;;  %v2093_v30 = vcvt.s32.f32 %v2092_v25  ;;  %v2070_v54 = vand.u32 2147483647, %v2069_v43 }
 0x346   : > { %1650 = vst [vmem:[%s3019_s14 + $0x50] sm:$0xff] %v1634_v51  ;;  %v1616_v39 = vsel %vm1398_vm5, %v2897_v57, %v1599_v48  ;;  %v1602_v12 = vadd.f32 %v2986_v45, %v1565_v7  ;;  %v1557_v49 = vadd.f32 %v1556_v21, %v2740_v50  ;;  %v2088_v4 = vor.u32 %v2087_v0, %v2086_v1 }
 0x347   : > { %v1632_v9 = vsel %vm1607_vm4, %v1390_v5, %v1616_v39  ;;  %v2077_v40 = vcvt.s32.f32 %v2076_v29  ;;  %v2094_v32 = vand.u32 2147483647, %v2093_v30  ;;  %v2066_v17 = vand.u32 2147483647, %v3185_v36 }
 0x348   : > { %1648 = vst [vmem:[%s3019_s14 + $0x40] sm:$0xff] %v1632_v9  ;;  %v1619_v57 = vsel %vm1398_vm5, %v2910_v16, %v1602_v12  ;;  %v1600_v2 = vadd.f32 %v2986_v45, %v1557_v49  ;;  %v2095_v33 = vand.u32 2147483648, %v3199_v34  ;;  %vm3229_vm1 = vcmp.lt.f32.partialorder %v2082_v27, 8388608.0 }
 0x349   : > { %v1635_v50 = vsel %vm1607_vm4, %v1393_v44, %v1619_v57  ;;  %v2078_v56 = vand.u32 2147483647, %v2077_v40  ;;  %v2090_v20 = vand.u32 2147483647, %v3199_v34  ;;  %v2079_v31 = vand.u32 2147483648, %v3209_v26 }
 0x34a   : > { %1651 = vst [vmem:[%s3019_s14 + $0x58] sm:$0xff] %v1635_v50  ;;  %v1617_v53 = vsel %vm1398_vm5, %v2900_v14, %v1600_v2  ;;  %v2071_v14 = vand.u32 2147483648, %v3185_v36  ;;  %v2096_v60 = vor.u32 %v2095_v33, %v2094_v32  ;;  %v2089_v28 = vsel %vm3229_vm1, %v2088_v4, %v3168_v35 }
 0x34b   : > { %v1633_v16 = vsel %vm1607_vm4, %v1391_v38, %v1617_v53  ;;  %vm3239_vm0 = vcmp.lt.f32.partialorder %v2066_v17, 8388608.0  ;;  %v2074_v13 = vand.u32 2147483647, %v3209_v26  ;;  %v1004_v48 = vadd.f32 %v970_v8, %v754_v52 }
 0x34c   : > { %1649 = vst [vmem:[%s3019_s14 + $0x48] sm:$0xff] %v1633_v16  ;;  %v2072_v42 = vor.u32 %v2071_v14, %v2070_v54  ;;  %v2080_v55 = vor.u32 %v2079_v31, %v2078_v56  ;;  %vm3249_vm2 = vcmp.lt.f32.partialorder %v2090_v20, 8388608.0  ;;  %v1396_v51 = vmax.f32 %v2089_v28, 1.0 }
 0x34d   : > { %vm3260_vm3 = vcmp.lt.f32.partialorder %v2074_v13, 8388608.0 }
 0x34e   : > { %v2073_v61 = vsel %vm3239_vm0, %v2072_v42, %v3185_v36  ;;  %v2097_v36 = vsel %vm3249_vm2, %v2096_v60, %v3199_v34  ;;  %v2081_v34 = vsel %vm3260_vm3, %v2080_v55, %v3209_v26 }
 0x34f   : > { %v1394_v62 = vmax.f32 %v2073_v61, 1.0  ;;  %v1397_v57 = vmax.f32 %v2097_v36, 1.0  ;;  %v1395_v26 = vmax.f32 %v2081_v34, 1.0 }
 0x355   : > { %v1968_v22 = vpop.f32.mrf.mxu1 }
 0x356   : > { %v1578_v6 = vadd.f32 %v1968_v22, %v2760_v37 }
 0x357   : > { %v1569_v41 = vpop.f32.mrf.mxu1 }
 0x358   : > { %v1605_v7 = vadd.f32 %v2986_v45, %v1578_v6  ;;  %v1570_v35 = vadd.f32 %v1569_v41, %v2752_v23 }
 0x359   : > { %v1969_v5 = vpop.f32.mrf.mxu1 }
 0x35a   : > { %v1622_v21 = vsel %vm1398_vm5, %v2938_v63, %v1605_v7  ;;  %v1603_v24 = vadd.f32 %v2986_v45, %v1570_v35  ;;  %v1581_v23 = vadd.f32 %v1969_v5, %v1004_v48 }
 0x35b   : > { %v1638_v12 = vsel %vm1607_vm4, %v1396_v51, %v1622_v21  ;;  %v1572_v49 = vpop.f32.mrf.mxu1 }
 0x35c   : > { %1654 = vst [vmem:[%s3019_s14 + $0x70] sm:$0xff] %v1638_v12  ;;  %v1620_v63 = vsel %vm1398_vm5, %v2929_v59, %v1603_v24  ;;  %v1606_v15 = vadd.f32 %v2986_v45, %v1581_v23  ;;  %v1573_v9 = vadd.f32 %v1572_v49, %v2756_v47  ;;  %v3389_v47 = vld [vmem:[#allocation6_spill] sm:$0xff] }
 0x35d   : > { %v1636_v44 = vsel %vm1607_vm4, %v1394_v62, %v1620_v63 }
 0x35e   : > { %1652 = vst [vmem:[%s3019_s14 + $0x60] sm:$0xff] %v1636_v44  ;;  %v1623_v59 = vsel %vm1398_vm5, %v2926_v58, %v1606_v15  ;;  %v1604_v2 = vadd.f32 %v2986_v45, %v1573_v9 }
 0x35f   : > { %v1639_v18 = vsel %vm1607_vm4, %v1397_v57, %v1623_v59 }
 0x360   : > { %1655 = vst [vmem:[%s3019_s14 + $0x78] sm:$0xff] %v1639_v18  ;;  %v1621_v58 = vsel %vm1398_vm5, %v3389_v47, %v1604_v2 }
 0x361   : > { %v1637_v45 = vsel %vm1607_vm4, %v1395_v26, %v1621_v58 }
 0x362   : > { %1653 = vst [vmem:[%s3019_s14 + $0x68] sm:$0xff] %v1637_v45 }
 0x363   : > { %2302 = shalt.err (!%p2299_p3)
}
 0x364   : > { %s2303_s30 = scalar_lea.hbm %s3289_s22, 2048  ;;  %s2307_s9 = scalar_lea.hbm %s3347_s5, 4096 }
 0x365   : > { %p2304_p4 = scmp.ne.s32.totalorder %s3289_s22, %s2303_s30  ;;  %p2308_p9 = scmp.lt.s32.totalorder %s3289_s22, %s3347_s5 }
 0x366   : > { %p2309_p10 = scmp.lt.s32.totalorder %s2307_s9, %s2303_s30 }
 0x367   : > { %p2305_p7 = pnand %p2304_p4, %p2424_p5 }
 0x368   : > { %p2310_p11 = por %p2309_p10, %p2308_p9 }
 0x369   : > { %p2306_p8 = pneg %p2305_p7 }
 0x36b   : > { %p2311_p12 = pnand %p2310_p11, %p2306_p8 }
 0x36d   : > { %2314 = shalt.err (!%p2311_p12)
}
 0x36e   : > { %s2354_s14 = smov 128   ;;  %s2355_s15 = smov 8  }
 0x36f   : > { %2098 = dma.vmem_to_hbm [thread:$0]  (%p2424_p5), %s3291_s16, 2048, %s3289_s22, %s3302_s26, %s2354_s14, %s2354_s14, %s2355_s15  }
 0x370 PF: > { %p2104_p13 = scmp.ge.s32.totalorder %s2349_s21, 2  ;;  %s1685_s17 = sand.u32 1, %s2337_s18  }
 0x371   : > { %s1686_s23 = scalar_lea.sflag [#allocation3], %s1685_s17 }
 0x372   : > { %p2101_p0 = pnand %p2104_p13, %p2428_p6 }
 0x374   : > { %p2102_p1 = pneg %p2101_p0 }
 0x376   : > { %2332 = dma.done.wait (%p2102_p1), %s1686_s23, 2048  }
 0x377   : > { %2334 = vsyncadd (%p2102_p1), %s1686_s23, 4294965248  ;;  %p15_p2 = scmp.ge.s32.totalorder %s2411_s24, 4   ;;  %s3390_s18 = smov %s2341_s19 }
 0x378   : > { %s3391_s19 = smov %s2345_s20  ;;  %s3392_s20 = smov %s2422_s27 }
 0x379   : > { %s3393_s21 = smov %s2411_s24  ;;  %17 = sbr.rel (!%p15_p2) target bundleno = 3 (0x3), region = 81 }
 0x37e   :  { %1691 = vsyncpa [#allocation3], 1 }
 0x37f   :  { %1693 = vsyncpa [#allocation3 + $0x1], 1 }

</bundles_post_ra>
